<compile_context>
chip_gen: v7x
topology: tpu7x:2x2x1
jax: 0.10.0
libtpu: 0.0.40
codegen_flags: <defaults>
</compile_context>

<pallas_src>
import functools

import jax
import jax.numpy as jnp
from jax.experimental import pallas as pl
from jax.experimental.pallas import tpu as pltpu


def _layer_norm(z, gamma, beta, eps=1e-5):
    mu = jnp.mean(z, axis=-1, keepdims=True)
    var = jnp.mean((z - mu) ** 2, axis=-1, keepdims=True)
    return (z - mu) * jax.lax.rsqrt(var + eps) * gamma + beta


def _bert_blocks_kernel(num_heads,
                        x_ref,                                # (Bt, S, H) f32
                        mask_ref,                             # (Bt, 1, S) f32 additive bias
                        wqkv_ref, bqkv_ref, wo_ref, bo_ref,
                        g1_ref, be1_ref,
                        w1_ref, bf1_ref, w2_ref, bf2_ref,
                        g2_ref, be2_ref,
                        out_ref,                              # (Bt, S, H) f32 (VMEM-resident)
                        attn_scratch):                        # (Bt*S, H) f32 scratch
    l = pl.program_id(1)          # layer (innermost, "arbitrary")

    # Layer 0: seed the resident activation buffer.  out_ref keeps the same
    # block index over the whole layer axis, so it stays in VMEM.
    @pl.when(l == 0)
    def _():
        out_ref[...] = x_ref[...]

    x = out_ref[...]                                          # (Bt, S, H) f32
    Bt, S, H = x.shape
    nh = num_heads
    hd = H // nh
    scale = 1.0 / float(hd) ** 0.5

    x2 = x.reshape(Bt * S, H)
    xb = x2.astype(jnp.bfloat16)

    # --- fused Q/K/V projection: one (Bt*S, H) @ (H, 3H) MXU matmul ----------
    qkv = (jnp.dot(xb, wqkv_ref[0], preferred_element_type=jnp.float32)
           + bqkv_ref[0])                                     # (Bt*S, 3H) f32
    qkvb = qkv.astype(jnp.bfloat16)                           # cast once for the MXU
    q = qkvb[:, 0 * H:1 * H].reshape(Bt, S, H)
    k = qkvb[:, 1 * H:2 * H].reshape(Bt, S, H)
    v = qkvb[:, 2 * H:3 * H].reshape(Bt, S, H)

    # layer-invariant additive key mask, read once (hoisted out of head loop)
    mask = mask_ref[...]                                      # (Bt, 1, S) f32

    # --- multi-head attention (static loop over heads; single batch dim per
    #     einsum for robust MXU lowering).  Head outputs land directly in the
    #     lane-offset slice of a VMEM scratch -> no concatenate / relayout. ---
    for h in range(nh):
        sl = slice(h * hd, (h + 1) * hd)
        sc = jnp.einsum('bqd,bkd->bqk', q[:, :, sl], k[:, :, sl],
                        preferred_element_type=jnp.float32) * scale
        sc = sc + mask                                        # broadcast over queries
        sc = sc - jnp.max(sc, axis=-1, keepdims=True)
        p = jnp.exp(sc)
        p = p * pl.reciprocal(jnp.sum(p, axis=-1, keepdims=True), approx=True)
        ho = jnp.einsum('bqk,bkd->bqd', p.astype(jnp.bfloat16), v[:, :, sl],
                        preferred_element_type=jnp.float32)   # (Bt, S, hd) f32
        attn_scratch[:, sl] = ho.reshape(Bt * S, hd)

    # single output-projection matmul over the concatenated heads
    attn = (jnp.dot(attn_scratch[...].astype(jnp.bfloat16), wo_ref[0],
                    preferred_element_type=jnp.float32) + bo_ref[0])

    # --- AddNorm 1 (dropout = identity) --------------------------------------
    y = _layer_norm(x2 + attn, g1_ref[0], be1_ref[0])

    # --- position-wise FFN ----------------------------------------------------
    # TODO(synk): for very large block_b*S and F, tile this over the F axis to
    # bound the (Bt*S, F) intermediate on v7x's 64 MiB VMEM.
    h1 = (jnp.dot(y.astype(jnp.bfloat16), w1_ref[0],
                  preferred_element_type=jnp.float32) + bf1_ref[0])
    h1 = jnp.maximum(h1, 0.0)
    ffn = (jnp.dot(h1.astype(jnp.bfloat16), w2_ref[0],
                   preferred_element_type=jnp.float32) + bf2_ref[0])

    # --- AddNorm 2 -> resident activation for the next layer -----------------
    out_ref[...] = _layer_norm(y + ffn, g2_ref[0], be2_ref[0]).reshape(Bt, S, H)


_W_NAMES = ["wqkv", "bqkv", "wo", "bo", "g1", "be1",
            "w1", "bf1", "w2", "bf2", "g2", "be2"]
_MM_NAMES = {"wqkv", "wo", "w1", "w2"}      # MXU operands -> stored/streamed as bf16


def bert_blocks(x, valid_lens, stacked, num_heads, block_b=None):
    """All encoder blocks in a single pallas_call (grid = (batch_blocks, layers))."""
    B, S, H = x.shape
    L = stacked["wqkv"].shape[0]
    assert H % num_heads == 0, "num_hiddens must be divisible by num_heads"
    if block_b is None:
        block_b = B
    assert B % block_b == 0, "block_b must divide the batch size"
    nb = B // block_b

    # Layer-invariant key mask as an additive bias, computed ONCE outside the
    # kernel (d2l masked_softmax: key index >= valid_len -> -1e6).
    mask_bias = jnp.where(
        jnp.arange(S, dtype=jnp.int32)[None, :] < valid_lens[:, None],
        0.0, -1e6).astype(jnp.float32).reshape(B, 1, S)

    weights, w_specs = [], []
    for n in _W_NAMES:
        w = stacked[n]
        if n in _MM_NAMES:
            w = w.astype(jnp.bfloat16)          # halve weight DMA / VMEM bytes
        weights.append(w)
        w_specs.append(pl.BlockSpec((1,) + w.shape[1:],
                                    lambda b, l: (l, 0, 0)))

    grid_spec = pltpu.PrefetchScalarGridSpec(
        num_scalar_prefetch=0,
        grid=(nb, L),
        in_specs=[pl.BlockSpec((block_b, S, H), lambda b, l: (b, 0, 0)),
                  pl.BlockSpec((block_b, 1, S), lambda b, l: (b, 0, 0))]
                 + w_specs,
        out_specs=pl.BlockSpec((block_b, S, H), lambda b, l: (b, 0, 0)),
        scratch_shapes=[pltpu.VMEM((block_b * S, H), jnp.float32)],
    )
    kernel = functools.partial(_bert_blocks_kernel, num_heads)
    return pl.pallas_call(
        kernel,
        grid_spec=grid_spec,
        out_shape=jax.ShapeDtypeStruct((B, S, H), jnp.float32),
        compiler_params=pltpu.CompilerParams(
            dimension_semantics=("parallel", "arbitrary"),
            # explicit scoped-VMEM limit (v5e default 16 MiB is too small for
            # realistic stacked-weight pipelines; re-derive block_b for v7x's
            # 64 MiB physical VMEM).
            vmem_limit_bytes=64 * 1024 * 1024),
    )(x, mask_bias, *weights)


def init_params(key, vocab_size, num_hiddens, ffn_num_hiddens, num_layers, max_len):
    H, F = num_hiddens, ffn_num_hiddens
    keys = jax.random.split(key, 3 + num_layers)
    tok_emb = 0.02 * jax.random.normal(keys[0], (vocab_size, H), jnp.float32)
    seg_emb = 0.02 * jax.random.normal(keys[1], (2, H), jnp.float32)
    pos_emb = jax.random.normal(keys[2], (1, max_len, H), jnp.float32)  # torch.randn
    layers = []
    for i in range(num_layers):
        lk = jax.random.split(keys[3 + i], 6)
        layers.append(dict(
            wq=0.02 * jax.random.normal(lk[0], (H, H), jnp.float32), bq=jnp.zeros((1, H), jnp.float32),
            wk=0.02 * jax.random.normal(lk[1], (H, H), jnp.float32), bk=jnp.zeros((1, H), jnp.float32),
            wv=0.02 * jax.random.normal(lk[2], (H, H), jnp.float32), bv=jnp.zeros((1, H), jnp.float32),
            wo=0.02 * jax.random.normal(lk[3], (H, H), jnp.float32), bo=jnp.zeros((1, H), jnp.float32),
            g1=jnp.ones((1, H), jnp.float32), be1=jnp.zeros((1, H), jnp.float32),
            w1=0.02 * jax.random.normal(lk[4], (H, F), jnp.float32), bf1=jnp.zeros((1, F), jnp.float32),
            w2=0.02 * jax.random.normal(lk[5], (F, H), jnp.float32), bf2=jnp.zeros((1, H), jnp.float32),
            g2=jnp.ones((1, H), jnp.float32), be2=jnp.zeros((1, H), jnp.float32),
        ))
    return tok_emb, seg_emb, pos_emb, layers


def stack_layers(layers):
    """Stack per-layer params on a leading axis; fuse wq|wk|wv -> wqkv (H, 3H)."""
    stacked = {
        "wqkv": jnp.stack([jnp.concatenate([lp["wq"], lp["wk"], lp["wv"]], axis=-1)
                           for lp in layers], axis=0),
        "bqkv": jnp.stack([jnp.concatenate([lp["bq"], lp["bk"], lp["bv"]], axis=-1)
                           for lp in layers], axis=0),
    }
    for k in ["wo", "bo", "g1", "be1", "w1", "bf1", "w2", "bf2", "g2", "be2"]:
        stacked[k] = jnp.stack([lp[k] for lp in layers], axis=0)
    return stacked


def bert_encoder_forward(tokens, segments, valid_lens,
                         tok_emb, seg_emb, pos_emb, layers, num_heads,
                         block_b=None):
    B, S = tokens.shape
    # embedding gathers are glue (plain JAX); all heavy compute is in the kernel
    X = tok_emb[tokens] + seg_emb[segments]                       # (B, S, H)
    # exact reproduction of `X + self.pos_embedding.data[:, X.shape[1], :]`
    X = X + pos_emb[:, S, :]                                      # (1, H) broadcast
    stacked = stack_layers(layers)
    return bert_blocks(X, valid_lens, stacked, num_heads, block_b=block_b)


if __name__ == "__main__":
    vocab_size = 100
    num_hiddens = 32
    ffn_num_hiddens = 64
    num_heads = 2
    num_layers = 2
    max_len = 64
    B, S = 2, 8

    key = jax.random.PRNGKey(0)
    k_tok, k_params = jax.random.split(key)

    tokens = jax.random.randint(k_tok, (B, S), 0, vocab_size, dtype=jnp.int32)
    segments = jnp.array([[0, 0, 0, 0, 1, 1, 1, 1],
                          [1, 1, 1, 1, 0, 0, 0, 0]], dtype=jnp.int32)
    valid_lens = jnp.array([8, 6], dtype=jnp.int32)

    tok_emb, seg_emb, pos_emb, layers = init_params(
        k_params, vocab_size, num_hiddens, ffn_num_hiddens, num_layers, max_len)

    # block_b = B // 2 -> two batch blocks on the "parallel" grid axis, so the
    # work can shard across both TensorCores on v7x (nb >= 2).  For realistic
    # sizes pick block_b so block_b*S covers the weight-streaming roofline
    # (~250 tokens on v5e, ~700 on v6e / per-core on v7x) and fits VMEM.
    out = bert_encoder_forward(tokens, segments, valid_lens,
                               tok_emb, seg_emb, pos_emb, layers, num_heads,
                               block_b=B // 2)
    out = jax.block_until_ready(out)
    assert out.shape == (B, S, num_hiddens) and out.dtype == jnp.float32
    assert bool(jnp.all(jnp.isfinite(out)))
    print("KERNEL_OK")
</pallas_src>

<mosaic_0001>
module attributes {stable_mosaic.version = 11 : i64} {
  func.func @_bert_blocks_kernel(%arg0: i32, %arg1: i32, %arg2: memref<1x8x32xf32, #tpu.memory_space<vmem>>, %arg3: memref<1x1x8xf32, #tpu.memory_space<vmem>>, %arg4: memref<1x32x96xbf16, #tpu.memory_space<vmem>>, %arg5: memref<1x1x96xf32, #tpu.memory_space<vmem>>, %arg6: memref<1x32x32xbf16, #tpu.memory_space<vmem>>, %arg7: memref<1x1x32xf32, #tpu.memory_space<vmem>>, %arg8: memref<1x1x32xf32, #tpu.memory_space<vmem>>, %arg9: memref<1x1x32xf32, #tpu.memory_space<vmem>>, %arg10: memref<1x32x64xbf16, #tpu.memory_space<vmem>>, %arg11: memref<1x1x64xf32, #tpu.memory_space<vmem>>, %arg12: memref<1x64x32xbf16, #tpu.memory_space<vmem>>, %arg13: memref<1x1x32xf32, #tpu.memory_space<vmem>>, %arg14: memref<1x1x32xf32, #tpu.memory_space<vmem>>, %arg15: memref<1x1x32xf32, #tpu.memory_space<vmem>>, %arg16: memref<1x8x32xf32, #tpu.memory_space<vmem>>, %arg17: memref<8x32xf32, #tpu.memory_space<vmem>>) attributes {dimension_semantics = [#tpu.dimension_semantics<parallel>, #tpu.dimension_semantics<arbitrary>], iteration_bounds = array<i64: 2, 2>, scalar_prefetch = 0 : i64, scratch_operands = 1 : i64, tpu.core_type = #tpu.core_type<tc>, window_params = [{transform_indices = @transform_0, window_bounds = array<i64: 1, 8, 32>}, {transform_indices = @transform_1, window_bounds = array<i64: 1, 1, 8>}, {transform_indices = @transform_2, window_bounds = array<i64: 1, 32, 96>}, {transform_indices = @transform_3, window_bounds = array<i64: 1, 1, 96>}, {transform_indices = @transform_4, window_bounds = array<i64: 1, 32, 32>}, {transform_indices = @transform_5, window_bounds = array<i64: 1, 1, 32>}, {transform_indices = @transform_6, window_bounds = array<i64: 1, 1, 32>}, {transform_indices = @transform_7, window_bounds = array<i64: 1, 1, 32>}, {transform_indices = @transform_8, window_bounds = array<i64: 1, 32, 64>}, {transform_indices = @transform_9, window_bounds = array<i64: 1, 1, 64>}, {transform_indices = @transform_10, window_bounds = array<i64: 1, 64, 32>}, {transform_indices = @transform_11, window_bounds = array<i64: 1, 1, 32>}, {transform_indices = @transform_12, window_bounds = array<i64: 1, 1, 32>}, {transform_indices = @transform_13, window_bounds = array<i64: 1, 1, 32>}, {transform_indices = @transform_14, window_bounds = array<i64: 1, 8, 32>}]} {
    %c0_i32 = arith.constant 0 : i32
    %0 = arith.cmpi eq, %arg1, %c0_i32 : i32
    %1 = arith.extui %0 : i1 to i32
    %c0_i32_0 = arith.constant 0 : i32
    %2 = arith.cmpi ne, %1, %c0_i32_0 : i32
    scf.if %2 {
      %c0_74 = arith.constant 0 : index
      %c0_75 = arith.constant 0 : index
      %c0_76 = arith.constant 0 : index
      %148 = vector.load %arg2[%c0_74, %c0_75, %c0_76] : memref<1x8x32xf32, #tpu.memory_space<vmem>>, vector<1x8x32xf32>
      %c0_77 = arith.constant 0 : index
      %c0_78 = arith.constant 0 : index
      %c0_79 = arith.constant 0 : index
      %149 = vector.load %arg16[%c0_77, %c0_78, %c0_79] : memref<1x8x32xf32, #tpu.memory_space<vmem>>, vector<1x8x32xf32>
      tpu.vector_store %arg16[%c0_77, %c0_78, %c0_79], %148 {strides = array<i32>} : memref<1x8x32xf32, #tpu.memory_space<vmem>>, vector<1x8x32xf32>,
    } else {
    }
    %c0 = arith.constant 0 : index
    %c0_1 = arith.constant 0 : index
    %c0_2 = arith.constant 0 : index
    %3 = vector.load %arg16[%c0, %c0_1, %c0_2] : memref<1x8x32xf32, #tpu.memory_space<vmem>>, vector<1x8x32xf32>
    %4 = vector.shape_cast %3 : vector<1x8x32xf32> to vector<8x32xf32>
    %5 = arith.truncf %4 : vector<8x32xf32> to vector<8x32xbf16>
    %c0_3 = arith.constant 0 : index
    %c0_4 = arith.constant 0 : index
    %c0_5 = arith.constant 0 : index
    %6 = vector.load %arg4[%c0_3, %c0_4, %c0_5] : memref<1x32x96xbf16, #tpu.memory_space<vmem>>, vector<1x32x96xbf16>
    %7 = vector.shape_cast %6 : vector<1x32x96xbf16> to vector<32x96xbf16>
    %cst = arith.constant dense<0.000000e+00> : vector<8x96xf32>
    %8 = tpu.matmul %5, %7, %cst {dimension_numbers = #tpu.dot_dimension_numbers<[1], [0], [0], [1], [0, 0, 1, 1], [], []>} : vector<8x32xbf16>, vector<32x96xbf16>, vector<8x96xf32> -> vector<8x96xf32>
    %c0_6 = arith.constant 0 : index
    %c0_7 = arith.constant 0 : index
    %c0_8 = arith.constant 0 : index
    %9 = vector.load %arg5[%c0_6, %c0_7, %c0_8] : memref<1x1x96xf32, #tpu.memory_space<vmem>>, vector<1x1x96xf32>
    %10 = vector.shape_cast %9 : vector<1x1x96xf32> to vector<1x96xf32>
    %11 = vector.broadcast %10 : vector<1x96xf32> to vector<8x96xf32>
    %12 = arith.addf %8, %11 : vector<8x96xf32>
    %13 = arith.truncf %12 : vector<8x96xf32> to vector<8x96xbf16>
    %14 = vector.extract_strided_slice %13 {offsets = [0, 0], sizes = [8, 32], strides = [1, 1]} : vector<8x96xbf16> to vector<8x32xbf16>
    %15 = vector.shape_cast %14 : vector<8x32xbf16> to vector<1x8x32xbf16>
    %16 = vector.extract_strided_slice %13 {offsets = [0, 32], sizes = [8, 32], strides = [1, 1]} : vector<8x96xbf16> to vector<8x32xbf16>
    %17 = vector.shape_cast %16 : vector<8x32xbf16> to vector<1x8x32xbf16>
    %18 = vector.extract_strided_slice %13 {offsets = [0, 64], sizes = [8, 32], strides = [1, 1]} : vector<8x96xbf16> to vector<8x32xbf16>
    %19 = vector.shape_cast %18 : vector<8x32xbf16> to vector<1x8x32xbf16>
    %c0_9 = arith.constant 0 : index
    %c0_10 = arith.constant 0 : index
    %c0_11 = arith.constant 0 : index
    %20 = vector.load %arg3[%c0_9, %c0_10, %c0_11] : memref<1x1x8xf32, #tpu.memory_space<vmem>>, vector<1x1x8xf32>
    %21 = vector.extract_strided_slice %15 {offsets = [0, 0, 0], sizes = [1, 8, 16], strides = [1, 1, 1]} : vector<1x8x32xbf16> to vector<1x8x16xbf16>
    %22 = vector.extract_strided_slice %17 {offsets = [0, 0, 0], sizes = [1, 8, 16], strides = [1, 1, 1]} : vector<1x8x32xbf16> to vector<1x8x16xbf16>
    "tpu.trace_start"() <{level = 10 : i32, message = "bqd,bkd->bqk"}> : () -> ()
    %cst_12 = arith.constant dense<0.000000e+00> : vector<1x8x8xf32>
    %23 = tpu.matmul %21, %22, %cst_12 {dimension_numbers = #tpu.dot_dimension_numbers<[2], [2], [1], [1], [0, 0, 0, 1, 1, 1], [0], [0]>} : vector<1x8x16xbf16>, vector<1x8x16xbf16>, vector<1x8x8xf32> -> vector<1x8x8xf32>
    "tpu.trace_stop"() : () -> ()
    %cst_13 = arith.constant 2.500000e-01 : f32
    %24 = vector.broadcast %cst_13 : f32 to vector<1x8x8xf32>
    %25 = arith.mulf %23, %24 : vector<1x8x8xf32>
    %26 = vector.broadcast %20 : vector<1x1x8xf32> to vector<1x8x8xf32>
    %27 = arith.addf %25, %26 : vector<1x8x8xf32>
    %cst_14 = arith.constant dense<0xFF800000> : vector<1x8xf32>
    %28 = vector.multi_reduction <maximumf>, %27, %cst_14 [2] : vector<1x8x8xf32> to vector<1x8xf32>
    %29 = vector.shape_cast %28 : vector<1x8xf32> to vector<1x8x1xf32>
    %30 = vector.broadcast %29 : vector<1x8x1xf32> to vector<1x8x8xf32>
    %31 = arith.subf %27, %30 : vector<1x8x8xf32>
    %32 = math.exp %31 : vector<1x8x8xf32>
    %cst_15 = arith.constant dense<0.000000e+00> : vector<1x8xf32>
    %33 = vector.multi_reduction <add>, %32, %cst_15 [2] : vector<1x8x8xf32> to vector<1x8xf32>
    %34 = vector.shape_cast %33 : vector<1x8xf32> to vector<1x8x1xf32>
    %35 = tpu.reciprocal %34 {approx = true} : vector<1x8x1xf32> -> vector<1x8x1xf32>
    %36 = vector.broadcast %35 : vector<1x8x1xf32> to vector<1x8x8xf32>
    %37 = arith.mulf %32, %36 : vector<1x8x8xf32>
    %38 = arith.truncf %37 : vector<1x8x8xf32> to vector<1x8x8xbf16>
    %39 = vector.extract_strided_slice %19 {offsets = [0, 0, 0], sizes = [1, 8, 16], strides = [1, 1, 1]} : vector<1x8x32xbf16> to vector<1x8x16xbf16>
    "tpu.trace_start"() <{level = 10 : i32, message = "bqk,bkd->bqd"}> : () -> ()
    %cst_16 = arith.constant dense<0.000000e+00> : vector<1x8x16xf32>
    %40 = tpu.matmul %38, %39, %cst_16 {dimension_numbers = #tpu.dot_dimension_numbers<[2], [1], [1], [2], [0, 0, 0, 1, 1, 2], [0], [0]>} : vector<1x8x8xbf16>, vector<1x8x16xbf16>, vector<1x8x16xf32> -> vector<1x8x16xf32>
    "tpu.trace_stop"() : () -> ()
    %41 = vector.shape_cast %40 : vector<1x8x16xf32> to vector<8x16xf32>
    %c0_17 = arith.constant 0 : index
    %c0_18 = arith.constant 0 : index
    %42 = vector.load %arg17[%c0_17, %c0_18] : memref<8x32xf32, #tpu.memory_space<vmem>>, vector<8x16xf32>
    tpu.vector_store %arg17[%c0_17, %c0_18], %41 {strides = array<i32>} : memref<8x32xf32, #tpu.memory_space<vmem>>, vector<8x16xf32>,
    %43 = vector.extract_strided_slice %15 {offsets = [0, 0, 16], sizes = [1, 8, 16], strides = [1, 1, 1]} : vector<1x8x32xbf16> to vector<1x8x16xbf16>
    %44 = vector.extract_strided_slice %17 {offsets = [0, 0, 16], sizes = [1, 8, 16], strides = [1, 1, 1]} : vector<1x8x32xbf16> to vector<1x8x16xbf16>
    "tpu.trace_start"() <{level = 10 : i32, message = "bqd,bkd->bqk"}> : () -> ()
    %cst_19 = arith.constant dense<0.000000e+00> : vector<1x8x8xf32>
    %45 = tpu.matmul %43, %44, %cst_19 {dimension_numbers = #tpu.dot_dimension_numbers<[2], [2], [1], [1], [0, 0, 0, 1, 1, 1], [0], [0]>} : vector<1x8x16xbf16>, vector<1x8x16xbf16>, vector<1x8x8xf32> -> vector<1x8x8xf32>
    "tpu.trace_stop"() : () -> ()
    %cst_20 = arith.constant 2.500000e-01 : f32
    %46 = vector.broadcast %cst_20 : f32 to vector<1x8x8xf32>
    %47 = arith.mulf %45, %46 : vector<1x8x8xf32>
    %48 = vector.broadcast %20 : vector<1x1x8xf32> to vector<1x8x8xf32>
    %49 = arith.addf %47, %48 : vector<1x8x8xf32>
    %cst_21 = arith.constant dense<0xFF800000> : vector<1x8xf32>
    %50 = vector.multi_reduction <maximumf>, %49, %cst_21 [2] : vector<1x8x8xf32> to vector<1x8xf32>
    %51 = vector.shape_cast %50 : vector<1x8xf32> to vector<1x8x1xf32>
    %52 = vector.broadcast %51 : vector<1x8x1xf32> to vector<1x8x8xf32>
    %53 = arith.subf %49, %52 : vector<1x8x8xf32>
    %54 = math.exp %53 : vector<1x8x8xf32>
    %cst_22 = arith.constant dense<0.000000e+00> : vector<1x8xf32>
    %55 = vector.multi_reduction <add>, %54, %cst_22 [2] : vector<1x8x8xf32> to vector<1x8xf32>
    %56 = vector.shape_cast %55 : vector<1x8xf32> to vector<1x8x1xf32>
    %57 = tpu.reciprocal %56 {approx = true} : vector<1x8x1xf32> -> vector<1x8x1xf32>
    %58 = vector.broadcast %57 : vector<1x8x1xf32> to vector<1x8x8xf32>
    %59 = arith.mulf %54, %58 : vector<1x8x8xf32>
    %60 = arith.truncf %59 : vector<1x8x8xf32> to vector<1x8x8xbf16>
    %61 = vector.extract_strided_slice %19 {offsets = [0, 0, 16], sizes = [1, 8, 16], strides = [1, 1, 1]} : vector<1x8x32xbf16> to vector<1x8x16xbf16>
    "tpu.trace_start"() <{level = 10 : i32, message = "bqk,bkd->bqd"}> : () -> ()
    %cst_23 = arith.constant dense<0.000000e+00> : vector<1x8x16xf32>
    %62 = tpu.matmul %60, %61, %cst_23 {dimension_numbers = #tpu.dot_dimension_numbers<[2], [1], [1], [2], [0, 0, 0, 1, 1, 2], [0], [0]>} : vector<1x8x8xbf16>, vector<1x8x16xbf16>, vector<1x8x16xf32> -> vector<1x8x16xf32>
    "tpu.trace_stop"() : () -> ()
    %63 = vector.shape_cast %62 : vector<1x8x16xf32> to vector<8x16xf32>
    %c0_24 = arith.constant 0 : index
    %c16 = arith.constant 16 : index
    %64 = vector.load %arg17[%c0_24, %c16] : memref<8x32xf32, #tpu.memory_space<vmem>>, vector<8x16xf32>
    tpu.vector_store %arg17[%c0_24, %c16], %63 {strides = array<i32>} : memref<8x32xf32, #tpu.memory_space<vmem>>, vector<8x16xf32>,
    %c0_25 = arith.constant 0 : index
    %c0_26 = arith.constant 0 : index
    %65 = vector.load %arg17[%c0_25, %c0_26] : memref<8x32xf32, #tpu.memory_space<vmem>>, vector<8x32xf32>
    %66 = arith.truncf %65 : vector<8x32xf32> to vector<8x32xbf16>
    %c0_27 = arith.constant 0 : index
    %c0_28 = arith.constant 0 : index
    %c0_29 = arith.constant 0 : index
    %67 = vector.load %arg6[%c0_27, %c0_28, %c0_29] : memref<1x32x32xbf16, #tpu.memory_space<vmem>>, vector<1x32x32xbf16>
    %68 = vector.shape_cast %67 : vector<1x32x32xbf16> to vector<32x32xbf16>
    %cst_30 = arith.constant dense<0.000000e+00> : vector<8x32xf32>
    %69 = tpu.matmul %66, %68, %cst_30 {dimension_numbers = #tpu.dot_dimension_numbers<[1], [0], [0], [1], [0, 0, 1, 1], [], []>} : vector<8x32xbf16>, vector<32x32xbf16>, vector<8x32xf32> -> vector<8x32xf32>
    %c0_31 = arith.constant 0 : index
    %c0_32 = arith.constant 0 : index
    %c0_33 = arith.constant 0 : index
    %70 = vector.load %arg7[%c0_31, %c0_32, %c0_33] : memref<1x1x32xf32, #tpu.memory_space<vmem>>, vector<1x1x32xf32>
    %71 = vector.shape_cast %70 : vector<1x1x32xf32> to vector<1x32xf32>
    %72 = vector.broadcast %71 : vector<1x32xf32> to vector<8x32xf32>
    %73 = arith.addf %69, %72 : vector<8x32xf32>
    %74 = arith.addf %4, %73 : vector<8x32xf32>
    %c0_34 = arith.constant 0 : index
    %c0_35 = arith.constant 0 : index
    %c0_36 = arith.constant 0 : index
    %75 = vector.load %arg8[%c0_34, %c0_35, %c0_36] : memref<1x1x32xf32, #tpu.memory_space<vmem>>, vector<1x1x32xf32>
    %76 = vector.shape_cast %75 : vector<1x1x32xf32> to vector<1x32xf32>
    %c0_37 = arith.constant 0 : index
    %c0_38 = arith.constant 0 : index
    %c0_39 = arith.constant 0 : index
    %77 = vector.load %arg9[%c0_37, %c0_38, %c0_39] : memref<1x1x32xf32, #tpu.memory_space<vmem>>, vector<1x1x32xf32>
    %78 = vector.shape_cast %77 : vector<1x1x32xf32> to vector<1x32xf32>
    %cst_40 = arith.constant dense<0.000000e+00> : vector<8xf32>
    %79 = vector.multi_reduction <add>, %74, %cst_40 [1] : vector<8x32xf32> to vector<8xf32>
    %80 = vector.shape_cast %79 : vector<8xf32> to vector<8x1xf32>
    %cst_41 = arith.constant 3.200000e+01 : f32
    %81 = vector.broadcast %cst_41 : f32 to vector<8x1xf32>
    %82 = arith.divf %80, %81 : vector<8x1xf32>
    %83 = vector.broadcast %82 : vector<8x1xf32> to vector<8x32xf32>
    %84 = arith.subf %74, %83 : vector<8x32xf32>
    %85 = arith.mulf %84, %84 : vector<8x32xf32>
    %cst_42 = arith.constant dense<0.000000e+00> : vector<8xf32>
    %86 = vector.multi_reduction <add>, %85, %cst_42 [1] : vector<8x32xf32> to vector<8xf32>
    %87 = vector.shape_cast %86 : vector<8xf32> to vector<8x1xf32>
    %cst_43 = arith.constant 3.200000e+01 : f32
    %88 = vector.broadcast %cst_43 : f32 to vector<8x1xf32>
    %89 = arith.divf %87, %88 : vector<8x1xf32>
    %90 = vector.broadcast %82 : vector<8x1xf32> to vector<8x32xf32>
    %91 = arith.subf %74, %90 : vector<8x32xf32>
    %cst_44 = arith.constant 9.99999974E-6 : f32
    %92 = vector.broadcast %cst_44 : f32 to vector<8x1xf32>
    %93 = arith.addf %89, %92 : vector<8x1xf32>
    %94 = math.rsqrt %93 : vector<8x1xf32>
    %95 = vector.broadcast %94 : vector<8x1xf32> to vector<8x32xf32>
    %96 = arith.mulf %91, %95 : vector<8x32xf32>
    %97 = vector.broadcast %76 : vector<1x32xf32> to vector<8x32xf32>
    %98 = arith.mulf %96, %97 : vector<8x32xf32>
    %99 = vector.broadcast %78 : vector<1x32xf32> to vector<8x32xf32>
    %100 = arith.addf %98, %99 : vector<8x32xf32>
    %101 = arith.truncf %100 : vector<8x32xf32> to vector<8x32xbf16>
    %c0_45 = arith.constant 0 : index
    %c0_46 = arith.constant 0 : index
    %c0_47 = arith.constant 0 : index
    %102 = vector.load %arg10[%c0_45, %c0_46, %c0_47] : memref<1x32x64xbf16, #tpu.memory_space<vmem>>, vector<1x32x64xbf16>
    %103 = vector.shape_cast %102 : vector<1x32x64xbf16> to vector<32x64xbf16>
    %cst_48 = arith.constant dense<0.000000e+00> : vector<8x64xf32>
    %104 = tpu.matmul %101, %103, %cst_48 {dimension_numbers = #tpu.dot_dimension_numbers<[1], [0], [0], [1], [0, 0, 1, 1], [], []>} : vector<8x32xbf16>, vector<32x64xbf16>, vector<8x64xf32> -> vector<8x64xf32>
    %c0_49 = arith.constant 0 : index
    %c0_50 = arith.constant 0 : index
    %c0_51 = arith.constant 0 : index
    %105 = vector.load %arg11[%c0_49, %c0_50, %c0_51] : memref<1x1x64xf32, #tpu.memory_space<vmem>>, vector<1x1x64xf32>
    %106 = vector.shape_cast %105 : vector<1x1x64xf32> to vector<1x64xf32>
    %107 = vector.broadcast %106 : vector<1x64xf32> to vector<8x64xf32>
    %108 = arith.addf %104, %107 : vector<8x64xf32>
    %cst_52 = arith.constant 0.000000e+00 : f32
    %109 = vector.broadcast %cst_52 : f32 to vector<8x64xf32>
    %110 = arith.maximumf %108, %109 : vector<8x64xf32>
    %111 = arith.truncf %110 : vector<8x64xf32> to vector<8x64xbf16>
    %c0_53 = arith.constant 0 : index
    %c0_54 = arith.constant 0 : index
    %c0_55 = arith.constant 0 : index
    %112 = vector.load %arg12[%c0_53, %c0_54, %c0_55] : memref<1x64x32xbf16, #tpu.memory_space<vmem>>, vector<1x64x32xbf16>
    %113 = vector.shape_cast %112 : vector<1x64x32xbf16> to vector<64x32xbf16>
    %cst_56 = arith.constant dense<0.000000e+00> : vector<8x32xf32>
    %114 = tpu.matmul %111, %113, %cst_56 {dimension_numbers = #tpu.dot_dimension_numbers<[1], [0], [0], [1], [0, 0, 1, 1], [], []>} : vector<8x64xbf16>, vector<64x32xbf16>, vector<8x32xf32> -> vector<8x32xf32>
    %c0_57 = arith.constant 0 : index
    %c0_58 = arith.constant 0 : index
    %c0_59 = arith.constant 0 : index
    %115 = vector.load %arg13[%c0_57, %c0_58, %c0_59] : memref<1x1x32xf32, #tpu.memory_space<vmem>>, vector<1x1x32xf32>
    %116 = vector.shape_cast %115 : vector<1x1x32xf32> to vector<1x32xf32>
    %117 = vector.broadcast %116 : vector<1x32xf32> to vector<8x32xf32>
    %118 = arith.addf %114, %117 : vector<8x32xf32>
    %119 = arith.addf %100, %118 : vector<8x32xf32>
    %c0_60 = arith.constant 0 : index
    %c0_61 = arith.constant 0 : index
    %c0_62 = arith.constant 0 : index
    %120 = vector.load %arg14[%c0_60, %c0_61, %c0_62] : memref<1x1x32xf32, #tpu.memory_space<vmem>>, vector<1x1x32xf32>
    %121 = vector.shape_cast %120 : vector<1x1x32xf32> to vector<1x32xf32>
    %c0_63 = arith.constant 0 : index
    %c0_64 = arith.constant 0 : index
    %c0_65 = arith.constant 0 : index
    %122 = vector.load %arg15[%c0_63, %c0_64, %c0_65] : memref<1x1x32xf32, #tpu.memory_space<vmem>>, vector<1x1x32xf32>
    %123 = vector.shape_cast %122 : vector<1x1x32xf32> to vector<1x32xf32>
    %cst_66 = arith.constant dense<0.000000e+00> : vector<8xf32>
    %124 = vector.multi_reduction <add>, %119, %cst_66 [1] : vector<8x32xf32> to vector<8xf32>
    %125 = vector.shape_cast %124 : vector<8xf32> to vector<8x1xf32>
    %cst_67 = arith.constant 3.200000e+01 : f32
    %126 = vector.broadcast %cst_67 : f32 to vector<8x1xf32>
    %127 = arith.divf %125, %126 : vector<8x1xf32>
    %128 = vector.broadcast %127 : vector<8x1xf32> to vector<8x32xf32>
    %129 = arith.subf %119, %128 : vector<8x32xf32>
    %130 = arith.mulf %129, %129 : vector<8x32xf32>
    %cst_68 = arith.constant dense<0.000000e+00> : vector<8xf32>
    %131 = vector.multi_reduction <add>, %130, %cst_68 [1] : vector<8x32xf32> to vector<8xf32>
    %132 = vector.shape_cast %131 : vector<8xf32> to vector<8x1xf32>
    %cst_69 = arith.constant 3.200000e+01 : f32
    %133 = vector.broadcast %cst_69 : f32 to vector<8x1xf32>
    %134 = arith.divf %132, %133 : vector<8x1xf32>
    %135 = vector.broadcast %127 : vector<8x1xf32> to vector<8x32xf32>
    %136 = arith.subf %119, %135 : vector<8x32xf32>
    %cst_70 = arith.constant 9.99999974E-6 : f32
    %137 = vector.broadcast %cst_70 : f32 to vector<8x1xf32>
    %138 = arith.addf %134, %137 : vector<8x1xf32>
    %139 = math.rsqrt %138 : vector<8x1xf32>
    %140 = vector.broadcast %139 : vector<8x1xf32> to vector<8x32xf32>
    %141 = arith.mulf %136, %140 : vector<8x32xf32>
    %142 = vector.broadcast %121 : vector<1x32xf32> to vector<8x32xf32>
    %143 = arith.mulf %141, %142 : vector<8x32xf32>
    %144 = vector.broadcast %123 : vector<1x32xf32> to vector<8x32xf32>
    %145 = arith.addf %143, %144 : vector<8x32xf32>
    %146 = vector.shape_cast %145 : vector<8x32xf32> to vector<1x8x32xf32>
    %c0_71 = arith.constant 0 : index
    %c0_72 = arith.constant 0 : index
    %c0_73 = arith.constant 0 : index
    %147 = vector.load %arg16[%c0_71, %c0_72, %c0_73] : memref<1x8x32xf32, #tpu.memory_space<vmem>>, vector<1x8x32xf32>
    tpu.vector_store %arg16[%c0_71, %c0_72, %c0_73], %146 {strides = array<i32>} : memref<1x8x32xf32, #tpu.memory_space<vmem>>, vector<1x8x32xf32>,
    return
  }
  func.func @transform_0(%arg0: i32, %arg1: i32) -> (i32, i32, i32) {
    %c0_i32 = arith.constant 0 : i32
    %c0_i32_0 = arith.constant 0 : i32
    %c0_i32_1 = arith.constant 0 : i32
    return %arg0, %c0_i32, %c0_i32_0 : i32, i32, i32
  }
  func.func @transform_1(%arg0: i32, %arg1: i32) -> (i32, i32, i32) {
    %c0_i32 = arith.constant 0 : i32
    %c0_i32_0 = arith.constant 0 : i32
    %c0_i32_1 = arith.constant 0 : i32
    return %arg0, %c0_i32, %c0_i32_0 : i32, i32, i32
  }
  func.func @transform_2(%arg0: i32, %arg1: i32) -> (i32, i32, i32) {
    %c0_i32 = arith.constant 0 : i32
    %c0_i32_0 = arith.constant 0 : i32
    %c0_i32_1 = arith.constant 0 : i32
    return %arg1, %c0_i32, %c0_i32_0 : i32, i32, i32
  }
  func.func @transform_3(%arg0: i32, %arg1: i32) -> (i32, i32, i32) {
    %c0_i32 = arith.constant 0 : i32
    %c0_i32_0 = arith.constant 0 : i32
    %c0_i32_1 = arith.constant 0 : i32
    return %arg1, %c0_i32, %c0_i32_0 : i32, i32, i32
  }
  func.func @transform_4(%arg0: i32, %arg1: i32) -> (i32, i32, i32) {
    %c0_i32 = arith.constant 0 : i32
    %c0_i32_0 = arith.constant 0 : i32
    %c0_i32_1 = arith.constant 0 : i32
    return %arg1, %c0_i32, %c0_i32_0 : i32, i32, i32
  }
  func.func @transform_5(%arg0: i32, %arg1: i32) -> (i32, i32, i32) {
    %c0_i32 = arith.constant 0 : i32
    %c0_i32_0 = arith.constant 0 : i32
    %c0_i32_1 = arith.constant 0 : i32
    return %arg1, %c0_i32, %c0_i32_0 : i32, i32, i32
  }
  func.func @transform_6(%arg0: i32, %arg1: i32) -> (i32, i32, i32) {
    %c0_i32 = arith.constant 0 : i32
    %c0_i32_0 = arith.constant 0 : i32
    %c0_i32_1 = arith.constant 0 : i32
    return %arg1, %c0_i32, %c0_i32_0 : i32, i32, i32
  }
  func.func @transform_7(%arg0: i32, %arg1: i32) -> (i32, i32, i32) {
    %c0_i32 = arith.constant 0 : i32
    %c0_i32_0 = arith.constant 0 : i32
    %c0_i32_1 = arith.constant 0 : i32
    return %arg1, %c0_i32, %c0_i32_0 : i32, i32, i32
  }
  func.func @transform_8(%arg0: i32, %arg1: i32) -> (i32, i32, i32) {
    %c0_i32 = arith.constant 0 : i32
    %c0_i32_0 = arith.constant 0 : i32
    %c0_i32_1 = arith.constant 0 : i32
    return %arg1, %c0_i32, %c0_i32_0 : i32, i32, i32
  }
  func.func @transform_9(%arg0: i32, %arg1: i32) -> (i32, i32, i32) {
    %c0_i32 = arith.constant 0 : i32
    %c0_i32_0 = arith.constant 0 : i32
    %c0_i32_1 = arith.constant 0 : i32
    return %arg1, %c0_i32, %c0_i32_0 : i32, i32, i32
  }
  func.func @transform_10(%arg0: i32, %arg1: i32) -> (i32, i32, i32) {
    %c0_i32 = arith.constant 0 : i32
    %c0_i32_0 = arith.constant 0 : i32
    %c0_i32_1 = arith.constant 0 : i32
    return %arg1, %c0_i32, %c0_i32_0 : i32, i32, i32
  }
  func.func @transform_11(%arg0: i32, %arg1: i32) -> (i32, i32, i32) {
    %c0_i32 = arith.constant 0 : i32
    %c0_i32_0 = arith.constant 0 : i32
    %c0_i32_1 = arith.constant 0 : i32
    return %arg1, %c0_i32, %c0_i32_0 : i32, i32, i32
  }
  func.func @transform_12(%arg0: i32, %arg1: i32) -> (i32, i32, i32) {
    %c0_i32 = arith.constant 0 : i32
    %c0_i32_0 = arith.constant 0 : i32
    %c0_i32_1 = arith.constant 0 : i32
    return %arg1, %c0_i32, %c0_i32_0 : i32, i32, i32
  }
  func.func @transform_13(%arg0: i32, %arg1: i32) -> (i32, i32, i32) {
    %c0_i32 = arith.constant 0 : i32
    %c0_i32_0 = arith.constant 0 : i32
    %c0_i32_1 = arith.constant 0 : i32
    return %arg1, %c0_i32, %c0_i32_0 : i32, i32, i32
  }
  func.func @transform_14(%arg0: i32, %arg1: i32) -> (i32, i32, i32) {
    %c0_i32 = arith.constant 0 : i32
    %c0_i32_0 = arith.constant 0 : i32
    %c0_i32_1 = arith.constant 0 : i32
    return %arg0, %c0_i32, %c0_i32_0 : i32, i32, i32
  }
}

</mosaic_0001>

<bundles_post_ra>
// kernel: tpu_custom_call.1
= control target key start
LH: loop header
LB: loop body
LE: loop exit
PB: predicated region body
PF: predicated region fallthrough
CT: control target
= control target key end

     0   :  { %s3648_s0 = inlined_call_operand.hbm [shape: f32[2,8,32], index: 0, kind: input, shape index: {}]   ;;  %s3649_s1 = inlined_call_operand.hbm [shape: f32[2,1,8], index: 1, kind: input, shape index: {}]   ;;  %s3650_s2 = inlined_call_operand.hbm [shape: bf16[2,32,96], index: 2, kind: input, shape index: {}]   ;;  %s3651_s3 = inlined_call_operand.hbm [shape: f32[2,1,96], index: 3, kind: input, shape index: {}]   ;;  %s3652_s4 = inlined_call_operand.hbm [shape: bf16[2,32,32], index: 4, kind: input, shape index: {}]   ;;  %s3653_s5 = inlined_call_operand.hbm [shape: f32[2,1,32], index: 5, kind: input, shape index: {}]   ;;  %s3654_s6 = inlined_call_operand.hbm [shape: f32[2,1,32], index: 6, kind: input, shape index: {}]   ;;  %s3655_s7 = inlined_call_operand.hbm [shape: f32[2,1,32], index: 7, kind: input, shape index: {}]   ;;  %s3656_s8 = inlined_call_operand.hbm [shape: bf16[2,32,64], index: 8, kind: input, shape index: {}]   ;;  %s3657_s9 = inlined_call_operand.hbm [shape: f32[2,1,64], index: 9, kind: input, shape index: {}]   ;;  %s3658_s10 = inlined_call_operand.hbm [shape: bf16[2,64,32], index: 10, kind: input, shape index: {}]   ;;  %s3659_s11 = inlined_call_operand.hbm [shape: f32[2,1,32], index: 11, kind: input, shape index: {}]   ;;  %s3660_s12 = inlined_call_operand.hbm [shape: f32[2,1,32], index: 12, kind: input, shape index: {}]   ;;  %s3661_s13 = inlined_call_operand.hbm [shape: f32[2,1,32], index: 13, kind: input, shape index: {}]   ;;  %s3662_s14 = inlined_call_operand.hbm [shape: f32[2,8,32], index: 14, kind: output, shape index: {}]  }
   0x1   :  { %3689 = sst [smem:[#allocation50_spill]] %s3648_s0 }
   0x2   :  { %3690 = sst [smem:[#allocation51_spill]] %s3649_s1 }
   0x3   :  { %3691 = sst [smem:[#allocation52_spill]] %s3650_s2 }
   0x4   :  { %3692 = sst [smem:[#allocation53_spill]] %s3651_s3 }
   0x5   :  { %3693 = sst [smem:[#allocation54_spill]] %s3652_s4 }
   0x6   :  { %3694 = sst [smem:[#allocation55_spill]] %s3653_s5 }
   0x7   :  { %3695 = sst [smem:[#allocation56_spill]] %s3654_s6 }
   0x8   :  { %3696 = sst [smem:[#allocation57_spill]] %s3655_s7 }
   0x9   :  { %3697 = sst [smem:[#allocation58_spill]] %s3656_s8 }
   0xa   :  { %3698 = sst [smem:[#allocation59_spill]] %s3657_s9 }
   0xb   :  { %3699 = sst [smem:[#allocation60_spill]] %s3658_s10 }
   0xc   :  { %3700 = sst [smem:[#allocation61_spill]] %s3659_s11 }
   0xd   :  { %3701 = sst [smem:[#allocation62_spill]] %s3660_s12 }
   0xe   :  { %3702 = sst [smem:[#allocation63_spill]] %s3661_s13 }
   0xf   :  { %3703 = sst [smem:[#allocation64_spill]] %s3662_s14 }
  0x10   :  { %19 = vsyncpa [#allocation4], 0 }
  0x11   :  { %21 = vsyncpa [#allocation4 + $0x1], 0 }
  0x12   :  { %22 = vsyncpa [#allocation7], 0 }
  0x13   :  { %24 = vsyncpa [#allocation7 + $0x1], 0 }
  0x14   :  { %25 = vsyncpa [#allocation10], 0 }
  0x15   :  { %27 = vsyncpa [#allocation10 + $0x1], 0 }
  0x16   :  { %28 = vsyncpa [#allocation13], 0 }
  0x17   :  { %30 = vsyncpa [#allocation13 + $0x1], 0 }
  0x18   :  { %31 = vsyncpa [#allocation16], 0 }
  0x19   :  { %33 = vsyncpa [#allocation16 + $0x1], 0 }
  0x1a   :  { %34 = vsyncpa [#allocation19], 0 }
  0x1b   :  { %36 = vsyncpa [#allocation19 + $0x1], 0 }
  0x1c   :  { %37 = vsyncpa [#allocation22], 0 }
  0x1d   :  { %39 = vsyncpa [#allocation22 + $0x1], 0 }
  0x1e   :  { %40 = vsyncpa [#allocation25], 0 }
  0x1f   :  { %42 = vsyncpa [#allocation25 + $0x1], 0 }
  0x20   :  { %43 = vsyncpa [#allocation5], 0 }
  0x21   :  { %45 = vsyncpa [#allocation5 + $0x1], 0  ;;  %s2847_s29 = smov 0   ;;  %s2849_s30 = smov 0  }
  0x22   :  { %s2851_s15 = smov 0   ;;  %s2853_s16 = smov 0  }
  0x23   :  { %s2855_s17 = smov 0   ;;  %s2857_s18 = smov 0  }
  0x24   :  { %s2859_s19 = smov 0   ;;  %s2861_s20 = smov 0  }
  0x25   :  { %s2863_s21 = smov 0   ;;  %s2865_s22 = smov 0  }
  0x26   :  { %s2867_s23 = smov 0  }
  0x27 LB: > { %3704 = sst [smem:[#allocation37_spill]] %s2709_s30  ;;  %s2903_s24 = sadd.s32 4294967295, %s2745_s23   ;;  %s2745_s23 = sphi %s2867_s23, %s51_s23   ;;  %s2741_s22 = sphi %s2865_s22, %s3781_s22   ;;  %s2737_s21 = sphi %s2863_s21, %s3780_s21   ;;  %s2733_s20 = sphi %s2861_s20, %s3779_s20   ;;  %s2729_s19 = sphi %s2859_s19, %s3778_s19   ;;  %s2725_s18 = sphi %s2857_s18, %s3777_s18   ;;  %s2721_s17 = sphi %s2855_s17, %s3776_s17   ;;  %s2717_s16 = sphi %s2853_s16, %s3775_s16   ;;  %s2713_s15 = sphi %s2851_s15, %s3774_s15   ;;  %s2709_s30 = sphi %s2849_s30, %s3773_s30   ;;  %s2705_s29 = sphi %s2847_s29, %s3767_s29  }
  0x28   : > { %3705 = sst [smem:[#allocation38_spill]] %s2717_s16  ;;  %s1893_s25 = sadd.s32 4294967294, %s2745_s23  }
  0x29   : > { %3706 = sst [smem:[#allocation39_spill]] %s2725_s18  ;;  %s60_s26 = sadd.s32 1, %s2737_s21 }
  0x2a   : > { %3707 = sst [smem:[#allocation40_spill]] %s2729_s19  ;;  %s63_s27 = sadd.s32 1, %s2741_s22 }
  0x2b   : > { %3708 = sst [smem:[#allocation41_spill]] %s2733_s20  ;;  %p61_p0 = scmp.ge.s32.totalorder %s60_s26, 2 }
  0x2c   : > { %3709 = sst [smem:[#allocation42_spill]] %s2903_s24  ;;  %s70_s28 = sadd.s32 1, %s2725_s18 }
  0x2d   : > { %p77_p1 = scmp.ne.s32.totalorder %s2725_s18, %s2721_s17  ;;  %p78_p2 = scmp.eq.s32.totalorder %s2745_s23, 0 }
  0x2e   : > { %s3783_s26 = smov (%p61_p0, %s60_s26), 0  ;;  %s3785_s27 = smov (!%p61_p0, %s63_s27), %s2741_s22 }
  0x2f   : > { %3710 = sst [smem:[#allocation43_spill]] %s3783_s26  ;;  %p2920_p3 = por %p78_p2, %p77_p1 }
  0x30   : > { %p3670_p4 = scmp.ne.s32.totalorder %s2721_s17, %s2717_s16  ;;  %p65_p5 = scmp.ge.s32.totalorder %s3785_s27, 2 }
  0x31   : > { %s3711_s14 = scalar_select %p2920_p3, 1, 0 }
  0x32   : > { %p84_p6 = scmp.eq.s32.totalorder %s2903_s24, 0  ;;  %s119_s20 = ssub.s32 %s2737_s21, %s3783_s26 }
  0x33   : > { %s122_s19 = sadd.s32 1, %s2713_s15  ;;  %s3787_s27 = smov (%p65_p5, %s3785_s27), 0 }
  0x34   : > { %3712 = sst [smem:[#allocation44_spill]] %s3787_s27  ;;  %p2937_p7 = por %p84_p6, %p3670_p4 }
  0x35   : > { %p120_p8 = scmp.eq.s32.totalorder %s119_s20, 0  ;;  %s67_s12 = ssub.s32 %s2741_s22, %s3787_s27 }
  0x36   : > { %s3713_s13 = scalar_select %p2937_p7, 1, 0 }
  0x37   : > { %p129_p9 = scmp.ne.s32.totalorder %s2713_s15, %s2709_s30  ;;  %p68_p10 = scmp.eq.s32.totalorder %s67_s12, 0 }
  0x38   : > { %p135_p11 = scmp.ne.s32.totalorder %s2709_s30, %s2705_s29  ;;  %p445_p0 = scmp.eq.s32.totalorder %s2903_s24, 3 }
  0x39   : > { %s2948_s10 = scalar_select %p120_p8, %s2713_s15, %s122_s19  }
  0x3a   : > { %s2951_s26 = scalar_select %p68_p10, %s2725_s18, %s70_s28  }
  0x3b   : > { %3714 = sst [smem:[#allocation45_spill]] %s2948_s10  ;;  %p2955_p12 = por %p129_p9, %p78_p2 }
  0x3c   : > { %3715 = sst [smem:[#allocation46_spill]] %s2951_s26  ;;  %p2961_p13 = por %p135_p11, %p84_p6 }
  0x3d   : > { %s3716_s8 = scalar_select %p2955_p12, 1, 0 }
  0x3e   : > { %s3717_s6 = scalar_select %p2961_p13, 1, 0 }
  0x3f   : > { %p451_p5 = scmp.eq.s32.totalorder %s1893_s25, 3  ;;  %p2969_p4 = por %p445_p0, %p77_p1 }
  0x40   : > { %3718 = sst [smem:[#allocation47_spill]] %s3717_s6  ;;  %p3721_p8 = scmp.ne.s32.totalorder %s2721_s17, %s2717_s16 }
  0x41   : > { %s3719_s12 = scalar_select %p2969_p4, 1, 0 }
  0x42   : > { %p2976_p10 = por %p451_p5, %p3721_p8  ;;  %p1895_p2 = scmp.ge.s32.totalorder %s2745_s23, 4 }
  0x43   : > { %3720 = sst [smem:[#allocation48_spill]] %s3719_s12  ;;  %s2982_s19 = sand.u32 (!%p1895_p2), 1, %s2725_s18  }
  0x44   : > { %s3722_s29 = scalar_select %p2976_p10, 1, 0 }
  0x45   : > { %467 = sbr.rel (%p1895_p2) target bundleno = 454 (0x1c6), region = 16  ;;  %s2985_s20 = sand.u32 (!%p1895_p2), 1, %s2745_s23  }
  0x46   : > { %3723 = sst [smem:[#allocation49_spill]] %s3722_s29  ;;  %s1898_s25 = sshll.u32 (!%p1895_p2), %s2741_s22, 4 }
  0x47   : > { %s492_s28 = scalar_lea.vmem (!%p1895_p2), [#allocation6], %s2982_s19  ;;  %s3724_s1 = sld [smem:[#allocation51_spill]] (!%p1895_p2) }
  0x48   : > { %s499_s27 = sshll.u32 (!%p1895_p2), %s492_s28, 4  ;;  %s3685_s16 = scalar_lea.sflag (!%p1895_p2), [#allocation7], %s2985_s20  ;;  %s500_s27 = int_to_ptr.vmem [resolvable:$true] %s499_s27 }
  0x4d   : > { %s2992_s29 = scalar_lea.hbm %s3724_s1, %s1898_s25  ;;  %s2203_s28 = scalar_lea.hbm %s3724_s1, 32 }
  0x4e   : > { %s2199_s18 = scalar_lea.hbm %s2992_s29, 16  ;;  %p2204_p11 = scmp.lt.u32.totalorder %s2992_s29, %s3724_s1 }
  0x4f   : > { %p2200_p1 = scmp.ne.s32.totalorder %s2992_s29, %s2199_s18  ;;  %p2205_p0 = scmp.lt.u32.totalorder %s2203_s28, %s2199_s18 }
  0x50   : > { %p2207_p8 = scmp.lt.u32.totalorder %s2199_s18, %s2992_s29 }
  0x51   : > { %p2201_p6 = pnand %p2200_p1, %p2920_p3  ;;  %p2206_p5 = por %p2205_p0, %p2204_p11 }
  0x53   : > { %p2202_p9 = pneg %p2201_p6  ;;  %p2208_p2 = por %p2207_p8, %p2206_p5 }
  0x55   : > { %p2209_p10 = pnand %p2208_p2, %p2202_p9 }
  0x57   : > { %2212 = shalt.err (!%p2209_p10)
}
  0x58   : > { %s2213_s10 = scalar_lea.vmem %s500_s27, 16  ;;  %s2747_s26 = smov [#allocation6]  }
  0x59   : > { %p2214_p4 = scmp.ne.s32.totalorder %s500_s27, %s2213_s10  ;;  %s2217_s25 = sshll.u32 %s2747_s26, 4  ;;  %s2218_s25 = int_to_ptr.vmem [resolvable:$false] %s2217_s25 }
  0x5a   : > { %s2219_s6 = scalar_lea.vmem %s2218_s25, 32  ;;  %p2220_p13 = scmp.lt.s32.totalorder %s500_s27, %s2218_s25 }
  0x5b   : > { %p2215_p1 = pnand %p2214_p4, %p2920_p3  ;;  %p2221_p7 = scmp.lt.s32.totalorder %s2219_s6, %s2213_s10 }
  0x5d   : > { %p2216_p6 = pneg %p2215_p1  ;;  %p2222_p12 = por %p2221_p7, %p2220_p13 }
  0x5f   : > { %p2223_p0 = pnand %p2222_p12, %p2216_p6 }
  0x61   : > { %2226 = shalt.err (!%p2223_p0)
}
  0x62   : > { %2045 = dma.hbm_to_vmem [thread:$0]  (%p2920_p3), %s2992_s29, 16, %s500_s27, %s3685_s16  }
  0x63   : > { %s3015_s30 = sand.u32 1, %s2713_s15   ;;  %s3018_s18 = sshll.u32 %s2737_s21, 4 }
  0x64   : > { %s3725_s3 = sld [smem:[#allocation53_spill]]  ;;  %s530_s10 = scalar_lea.vmem [#allocation9], %s3015_s30 }
  0x65   : > { %s537_s26 = sshll.u32 %s530_s10, 4  ;;  %p3726_p7 = scmp.ne.s32.totalorder %s3716_s8, 0  ;;  %s538_s26 = int_to_ptr.vmem [resolvable:$true] %s537_s26 }
  0x6a   : > { %s3024_s28 = scalar_lea.hbm %s3725_s3, %s3018_s18  ;;  %s2231_s16 = scalar_lea.hbm %s3725_s3, 32 }
  0x6b   : > { %s2227_s27 = scalar_lea.hbm %s3024_s28, 16  ;;  %p2232_p10 = scmp.lt.u32.totalorder %s3024_s28, %s3725_s3 }
  0x6c   : > { %p2228_p4 = scmp.ne.s32.totalorder %s3024_s28, %s2227_s27  ;;  %p2233_p9 = scmp.lt.u32.totalorder %s2231_s16, %s2227_s27 }
  0x6d   : > { %p2235_p5 = scmp.lt.u32.totalorder %s2227_s27, %s3024_s28 }
  0x6e   : > { %p2229_p12 = pnand %p2228_p4, %p3726_p7  ;;  %p2234_p11 = por %p2233_p9, %p2232_p10 }
  0x70   : > { %p2230_p13 = pneg %p2229_p12  ;;  %p2236_p8 = por %p2235_p5, %p2234_p11 }
  0x72   : > { %p2237_p2 = pnand %p2236_p8, %p2230_p13 }
  0x74   : > { %2240 = shalt.err (!%p2237_p2)
}
  0x75   : > { %s2241_s10 = scalar_lea.vmem %s538_s26, 16  ;;  %s2748_s25 = smov [#allocation9]  }
  0x76   : > { %p2242_p1 = scmp.ne.s32.totalorder %s538_s26, %s2241_s10  ;;  %s2245_s1 = sshll.u32 %s2748_s25, 4  ;;  %s2246_s1 = int_to_ptr.vmem [resolvable:$false] %s2245_s1 }
  0x77   : > { %s2247_s29 = scalar_lea.vmem %s2246_s1, 32  ;;  %p2248_p4 = scmp.lt.s32.totalorder %s538_s26, %s2246_s1 }
  0x78   : > { %p2243_p6 = pnand %p2242_p1, %p3726_p7  ;;  %p2249_p12 = scmp.lt.s32.totalorder %s2247_s29, %s2241_s10 }
  0x7a   : > { %p2244_p0 = pneg %p2243_p6  ;;  %p2250_p3 = por %p2249_p12, %p2248_p4 }
  0x7c   : > { %p2251_p9 = pnand %p2250_p3, %p2244_p0 }
  0x7e   : > { %2254 = shalt.err (!%p2251_p9)
}
  0x7f   : > { %s3727_s16 = scalar_lea.sflag [#allocation10], %s2985_s20  ;;  %s3728_s5 = sld [smem:[#allocation55_spill]] }
  0x80   : > { %2047 = dma.hbm_to_vmem [thread:$0]  (%p3726_p7), %s3024_s28, 16, %s538_s26, %s3727_s16  }
  0x81   : > { %s568_s1 = scalar_lea.vmem [#allocation12], %s3015_s30 }
  0x82   : > { %s575_s24 = sshll.u32 %s568_s1, 4  ;;  %s576_s24 = int_to_ptr.vmem [resolvable:$true] %s575_s24 }
  0x85   : > { %s3051_s25 = scalar_lea.hbm %s3728_s5, %s3018_s18  ;;  %s2259_s26 = scalar_lea.hbm %s3728_s5, 32 }
  0x86   : > { %s2255_s10 = scalar_lea.hbm %s3051_s25, 16  ;;  %p2260_p11 = scmp.lt.u32.totalorder %s3051_s25, %s3728_s5 }
  0x87   : > { %p2256_p3 = scmp.ne.s32.totalorder %s3051_s25, %s2255_s10  ;;  %p2261_p5 = scmp.lt.u32.totalorder %s2259_s26, %s2255_s10 }
  0x88   : > { %p2263_p2 = scmp.lt.u32.totalorder %s2255_s10, %s3051_s25 }
  0x89   : > { %p2257_p13 = pnand %p2256_p3, %p3726_p7  ;;  %p2262_p8 = por %p2261_p5, %p2260_p11 }
  0x8b   : > { %p2258_p10 = pneg %p2257_p13  ;;  %p2264_p1 = por %p2263_p2, %p2262_p8 }
  0x8d   : > { %p2265_p6 = pnand %p2264_p1, %p2258_p10 }
  0x8f   : > { %2268 = shalt.err (!%p2265_p6)
}
  0x90   : > { %s2269_s6 = scalar_lea.vmem %s576_s24, 16  ;;  %s2749_s1 = smov [#allocation12]  }
  0x91   : > { %p2270_p0 = scmp.ne.s32.totalorder %s576_s24, %s2269_s6  ;;  %s2273_s12 = sshll.u32 %s2749_s1, 4  ;;  %s2274_s12 = int_to_ptr.vmem [resolvable:$false] %s2273_s12 }
  0x92   : > { %s2275_s29 = scalar_lea.vmem %s2274_s12, 32  ;;  %p2276_p9 = scmp.lt.s32.totalorder %s576_s24, %s2274_s12 }
  0x93   : > { %p2271_p4 = pnand %p2270_p0, %p3726_p7  ;;  %p2277_p3 = scmp.lt.s32.totalorder %s2275_s29, %s2269_s6 }
  0x95   : > { %p2272_p12 = pneg %p2271_p4  ;;  %p2278_p13 = por %p2277_p3, %p2276_p9 }
  0x97   : > { %p2279_p5 = pnand %p2278_p13, %p2272_p12 }
  0x99   : > { %2282 = shalt.err (!%p2279_p5)
}
  0x9a   : > { %s3729_s10 = scalar_lea.sflag [#allocation13], %s2985_s20  ;;  %s3730_s7 = sld [smem:[#allocation57_spill]] }
  0x9b   : > { %2049 = dma.hbm_to_vmem [thread:$0]  (%p3726_p7), %s3051_s25, 16, %s576_s24, %s3729_s10  }
  0x9c   : > { %s602_s12 = scalar_lea.vmem [#allocation15], %s3015_s30 }
  0x9d   : > { %s609_s27 = sshll.u32 %s602_s12, 4  ;;  %s610_s27 = int_to_ptr.vmem [resolvable:$true] %s609_s27 }
  0xa0   : > { %s3078_s16 = scalar_lea.hbm %s3730_s7, %s3018_s18  ;;  %s2287_s24 = scalar_lea.hbm %s3730_s7, 32 }
  0xa1   : > { %s2283_s1 = scalar_lea.hbm %s3078_s16, 16  ;;  %p2288_p2 = scmp.lt.u32.totalorder %s3078_s16, %s3730_s7 }
  0xa2   : > { %p2284_p10 = scmp.ne.s32.totalorder %s3078_s16, %s2283_s1  ;;  %p2289_p1 = scmp.lt.u32.totalorder %s2287_s24, %s2283_s1 }
  0xa3   : > { %p2291_p0 = scmp.lt.u32.totalorder %s2283_s1, %s3078_s16 }
  0xa4   : > { %p2285_p11 = pnand %p2284_p10, %p3726_p7  ;;  %p2290_p6 = por %p2289_p1, %p2288_p2 }
  0xa6   : > { %p2286_p8 = pneg %p2285_p11  ;;  %p2292_p4 = por %p2291_p0, %p2290_p6 }
  0xa8   : > { %p2293_p12 = pnand %p2292_p4, %p2286_p8 }
  0xaa   : > { %2296 = shalt.err (!%p2293_p12)
}
  0xab   : > { %s2297_s26 = scalar_lea.vmem %s610_s27, 16  ;;  %s2750_s12 = smov [#allocation15]  }
  0xac   : > { %p2298_p9 = scmp.ne.s32.totalorder %s610_s27, %s2297_s26  ;;  %s2301_s6 = sshll.u32 %s2750_s12, 4  ;;  %s2302_s6 = int_to_ptr.vmem [resolvable:$false] %s2301_s6 }
  0xad   : > { %s2303_s29 = scalar_lea.vmem %s2302_s6, 32  ;;  %p2304_p5 = scmp.lt.s32.totalorder %s610_s27, %s2302_s6 }
  0xae   : > { %p2299_p3 = pnand %p2298_p9, %p3726_p7  ;;  %p2305_p10 = scmp.lt.s32.totalorder %s2303_s29, %s2297_s26 }
  0xb0   : > { %p2300_p13 = pneg %p2299_p3  ;;  %p2306_p11 = por %p2305_p10, %p2304_p5 }
  0xb2   : > { %p2307_p1 = pnand %p2306_p11, %p2300_p13 }
  0xb4   : > { %2310 = shalt.err (!%p2307_p1)
}
  0xb5   : > { %s3731_s1 = scalar_lea.sflag [#allocation16], %s2985_s20  ;;  %s3732_s9 = sld [smem:[#allocation59_spill]] }
  0xb6   : > { %2051 = dma.hbm_to_vmem [thread:$0]  (%p3726_p7), %s3078_s16, 16, %s610_s27, %s3731_s1  }
  0xb7   : > { %s640_s6 = scalar_lea.vmem [#allocation18], %s3015_s30 }
  0xb8   : > { %s647_s28 = sshll.u32 %s640_s6, 4  ;;  %s648_s28 = int_to_ptr.vmem [resolvable:$true] %s647_s28 }
  0xbb   : > { %s3105_s10 = scalar_lea.hbm %s3732_s9, %s3018_s18  ;;  %s2315_s27 = scalar_lea.hbm %s3732_s9, 32 }
  0xbc   : > { %s2311_s12 = scalar_lea.hbm %s3105_s10, 16  ;;  %p2316_p0 = scmp.lt.u32.totalorder %s3105_s10, %s3732_s9 }
  0xbd   : > { %p2312_p8 = scmp.ne.s32.totalorder %s3105_s10, %s2311_s12  ;;  %p2317_p4 = scmp.lt.u32.totalorder %s2315_s27, %s2311_s12 }
  0xbe   : > { %p2319_p9 = scmp.lt.u32.totalorder %s2311_s12, %s3105_s10 }
  0xbf   : > { %p2313_p2 = pnand %p2312_p8, %p3726_p7  ;;  %p2318_p12 = por %p2317_p4, %p2316_p0 }
  0xc1   : > { %p2314_p6 = pneg %p2313_p2  ;;  %p2320_p3 = por %p2319_p9, %p2318_p12 }
  0xc3   : > { %p2321_p13 = pnand %p2320_p3, %p2314_p6 }
  0xc5   : > { %2324 = shalt.err (!%p2321_p13)
}
  0xc6   : > { %s2325_s24 = scalar_lea.vmem %s648_s28, 16  ;;  %s2751_s6 = smov [#allocation18]  }
  0xc7   : > { %p2326_p5 = scmp.ne.s32.totalorder %s648_s28, %s2325_s24  ;;  %s2329_s26 = sshll.u32 %s2751_s6, 4  ;;  %s2330_s26 = int_to_ptr.vmem [resolvable:$false] %s2329_s26 }
  0xc8   : > { %s2331_s29 = scalar_lea.vmem %s2330_s26, 32  ;;  %p2332_p1 = scmp.lt.s32.totalorder %s648_s28, %s2330_s26 }
  0xc9   : > { %p2327_p10 = pnand %p2326_p5, %p3726_p7  ;;  %p2333_p8 = scmp.lt.s32.totalorder %s2331_s29, %s2325_s24 }
  0xcb   : > { %p2328_p11 = pneg %p2327_p10  ;;  %p2334_p2 = por %p2333_p8, %p2332_p1 }
  0xcd   : > { %p2335_p0 = pnand %p2334_p2, %p2328_p11 }
  0xcf   : > { %2338 = shalt.err (!%p2335_p0)
}
  0xd0   : > { %s3733_s12 = scalar_lea.sflag [#allocation19], %s2985_s20  ;;  %s3734_s11 = sld [smem:[#allocation61_spill]] }
  0xd1   : > { %2053 = dma.hbm_to_vmem [thread:$0]  (%p3726_p7), %s3105_s10, 16, %s648_s28, %s3733_s12  }
  0xd2   : > { %s678_s26 = scalar_lea.vmem [#allocation21], %s3015_s30 }
  0xd3   : > { %s685_s25 = sshll.u32 %s678_s26, 4  ;;  %s686_s25 = int_to_ptr.vmem [resolvable:$true] %s685_s25 }
  0xd6   : > { %s3132_s1 = scalar_lea.hbm %s3734_s11, %s3018_s18  ;;  %s2343_s28 = scalar_lea.hbm %s3734_s11, 32 }
  0xd7   : > { %s2339_s6 = scalar_lea.hbm %s3132_s1, 16  ;;  %p2344_p9 = scmp.lt.u32.totalorder %s3132_s1, %s3734_s11 }
  0xd8   : > { %p2340_p6 = scmp.ne.s32.totalorder %s3132_s1, %s2339_s6  ;;  %p2345_p3 = scmp.lt.u32.totalorder %s2343_s28, %s2339_s6 }
  0xd9   : > { %p2347_p5 = scmp.lt.u32.totalorder %s2339_s6, %s3132_s1 }
  0xda   : > { %p2341_p4 = pnand %p2340_p6, %p3726_p7  ;;  %p2346_p13 = por %p2345_p3, %p2344_p9 }
  0xdc   : > { %p2342_p12 = pneg %p2341_p4  ;;  %p2348_p10 = por %p2347_p5, %p2346_p13 }
  0xde   : > { %p2349_p11 = pnand %p2348_p10, %p2342_p12 }
  0xe0   : > { %2352 = shalt.err (!%p2349_p11)
}
  0xe1   : > { %s2353_s27 = scalar_lea.vmem %s686_s25, 16  ;;  %s2752_s26 = smov [#allocation21]  }
  0xe2   : > { %p2354_p1 = scmp.ne.s32.totalorder %s686_s25, %s2353_s27  ;;  %s2357_s24 = sshll.u32 %s2752_s26, 4  ;;  %s2358_s24 = int_to_ptr.vmem [resolvable:$false] %s2357_s24 }
  0xe3   : > { %s2359_s29 = scalar_lea.vmem %s2358_s24, 32  ;;  %p2360_p0 = scmp.lt.s32.totalorder %s686_s25, %s2358_s24 }
  0xe4   : > { %p2355_p8 = pnand %p2354_p1, %p3726_p7  ;;  %p2361_p6 = scmp.lt.s32.totalorder %s2359_s29, %s2353_s27 }
  0xe6   : > { %p2356_p2 = pneg %p2355_p8  ;;  %p2362_p4 = por %p2361_p6, %p2360_p0 }
  0xe8   : > { %p2363_p3 = pnand %p2362_p4, %p2356_p2 }
  0xea   : > { %2366 = shalt.err (!%p2363_p3)
}
  0xeb   : > { %s3735_s6 = scalar_lea.sflag [#allocation22], %s2985_s20  ;;  %s1896_s10 = sshll.u32 %s2982_s19, 3 }
  0xec   : > { %2055 = dma.hbm_to_vmem [thread:$0]  (%p3726_p7), %s3132_s1, 16, %s686_s25, %s3735_s6  }
  0xed   : > { %s1897_s28 = sshll.u32 %s2741_s22, 7  ;;  %s3736_s0 = sld [smem:[#allocation50_spill]] }
  0xee   : > { %s475_s27 = scalar_lea.vmem [#allocation3], %s1896_s10  ;;  %s3163_s29 = sshll.u32 %s3015_s30, 4 }
  0xef   : > { %s482_s26 = sshll.u32 %s475_s27, 4  ;;  %s472_s3 = scalar_lea.sflag [#allocation4], %s2982_s19  ;;  %s483_s26 = int_to_ptr.vmem [resolvable:$true] %s482_s26 }
  0xf0   : > { %p3737_p9 = scmp.ne.s32.totalorder %s3711_s14, 0 }
  0xf3   : > { %s3160_s24 = scalar_lea.hbm %s3736_s0, %s1897_s28  ;;  %s2371_s6 = scalar_lea.hbm %s3736_s0, 256 }
  0xf4   : > { %s2367_s5 = scalar_lea.hbm %s3160_s24, 128  ;;  %p2372_p10 = scmp.lt.u32.totalorder %s3160_s24, %s3736_s0 }
  0xf5   : > { %p2368_p12 = scmp.ne.s32.totalorder %s3160_s24, %s2367_s5  ;;  %p2373_p11 = scmp.lt.u32.totalorder %s2371_s6, %s2367_s5 }
  0xf6   : > { %p2375_p8 = scmp.lt.u32.totalorder %s2367_s5, %s3160_s24 }
  0xf7   : > { %p2369_p13 = pnand %p2368_p12, %p3737_p9  ;;  %p2374_p1 = por %p2373_p11, %p2372_p10 }
  0xf9   : > { %p2370_p5 = pneg %p2369_p13  ;;  %p2376_p2 = por %p2375_p8, %p2374_p1 }
  0xfb   : > { %p2377_p0 = pnand %p2376_p2, %p2370_p5 }
  0xfd   : > { %2380 = shalt.err (!%p2377_p0)
}
  0xfe   : > { %s2381_s19 = scalar_lea.vmem %s483_s26, 128  ;;  %s2753_s10 = smov [#allocation3]  }
  0xff   : > { %p2382_p6 = scmp.ne.s32.totalorder %s483_s26, %s2381_s19  ;;  %s2385_s16 = sshll.u32 %s2753_s10, 4  ;;  %s2386_s16 = int_to_ptr.vmem [resolvable:$false] %s2385_s16 }
 0x100   : > { %s2387_s27 = scalar_lea.vmem %s2386_s16, 256  ;;  %p2388_p12 = scmp.lt.s32.totalorder %s483_s26, %s2386_s16 }
 0x101   : > { %p2383_p4 = pnand %p2382_p6, %p3737_p9  ;;  %p2389_p13 = scmp.lt.s32.totalorder %s2387_s27, %s2381_s19 }
 0x103   : > { %p2384_p3 = pneg %p2383_p4  ;;  %p2390_p7 = por %p2389_p13, %p2388_p12 }
 0x105   : > { %p2391_p10 = pnand %p2390_p7, %p2384_p3 }
 0x107   : > { %2394 = shalt.err (!%p2391_p10)
}
 0x108   : > { %2044 = dma.hbm_to_vmem [thread:$0]  (%p3737_p9), %s3160_s24, 128, %s483_s26, %s472_s3  }
 0x109   : > { %s3184_s5 = sshll.u32 %s2737_s21, 8  ;;  %s510_s1 = scalar_lea.vmem [#allocation8], %s3163_s29 }
 0x10a   : > { %s517_s25 = sshll.u32 %s510_s1, 4  ;;  %s3738_s2 = sld [smem:[#allocation52_spill]]  ;;  %s3193_s25 = int_to_ptr.vmem [resolvable:$true] %s517_s25 }
 0x10b   : > { %p3739_p5 = scmp.ne.s32.totalorder %s3716_s8, 0 }
 0x110   : > { %s3191_s12 = scalar_lea.hbm %s3738_s2, %s3184_s5  ;;  %s2399_s26 = scalar_lea.hbm %s3738_s2, 512 }
 0x111   : > { %s2395_s14 = scalar_lea.hbm %s3191_s12, 256  ;;  %p2400_p1 = scmp.lt.u32.totalorder %s3191_s12, %s3738_s2 }
 0x112   : > { %p2396_p7 = scmp.ne.s32.totalorder %s3191_s12, %s2395_s14  ;;  %p2401_p8 = scmp.lt.u32.totalorder %s2399_s26, %s2395_s14 }
 0x113   : > { %p2403_p0 = scmp.lt.u32.totalorder %s2395_s14, %s3191_s12 }
 0x114   : > { %p2397_p9 = pnand %p2396_p7, %p3739_p5  ;;  %p2402_p2 = por %p2401_p8, %p2400_p1 }
 0x116   : > { %p2398_p11 = pneg %p2397_p9  ;;  %p2404_p6 = por %p2403_p0, %p2402_p2 }
 0x118   : > { %p2405_p4 = pnand %p2404_p6, %p2398_p11 }
 0x11a   : > { %2408 = shalt.err (!%p2405_p4)
}
 0x11b   : > { %s2409_s16 = scalar_lea.vmem %s3193_s25, 256  ;;  %s2754_s27 = smov [#allocation8]  }
 0x11c   : > { %p2410_p3 = scmp.ne.s32.totalorder %s3193_s25, %s2409_s16  ;;  %s2413_s1 = sshll.u32 %s2754_s27, 4  ;;  %s2414_s1 = int_to_ptr.vmem [resolvable:$false] %s2413_s1 }
 0x11d   : > { %s2415_s6 = scalar_lea.vmem %s2414_s1, 512  ;;  %p2416_p10 = scmp.lt.s32.totalorder %s3193_s25, %s2414_s1 }
 0x11e   : > { %p2411_p12 = pnand %p2410_p3, %p3739_p5  ;;  %p2417_p7 = scmp.lt.s32.totalorder %s2415_s6, %s2409_s16 }
 0x120   : > { %p2412_p13 = pneg %p2411_p12  ;;  %p2418_p9 = por %p2417_p7, %p2416_p10 }
 0x122   : > { %p2419_p1 = pnand %p2418_p9, %p2412_p13 }
 0x124   : > { %2422 = shalt.err (!%p2419_p1)
}
 0x125   : > { %s2755_s28 = smov 64   ;;  %s2756_s14 = smov 4  }
 0x126   : > { %s3740_s3 = scalar_lea.sflag [#allocation7], %s2985_s20  ;;  %s3741_s4 = sld [smem:[#allocation54_spill]] }
 0x127   : > { %2046 = dma.hbm_to_vmem [thread:$0]  (%p3739_p5), %s3191_s12, 256, %s3193_s25, %s3740_s3, %s2755_s28, %s2755_s28, %s2756_s14  }
 0x128   : > { %s548_s10 = scalar_lea.vmem [#allocation11], %s3163_s29  ;;  %s3742_s6 = sld [smem:[#allocation56_spill]] }
 0x129   : > { %s555_s16 = sshll.u32 %s548_s10, 4  ;;  %s3228_s16 = int_to_ptr.vmem [resolvable:$true] %s555_s16 }
 0x12c   : > { %s3225_s19 = scalar_lea.hbm %s3741_s4, %s3184_s5  ;;  %s2427_s3 = scalar_lea.hbm %s3741_s4, 512 }
 0x12d   : > { %s2423_s2 = scalar_lea.hbm %s3225_s19, 256  ;;  %p2428_p0 = scmp.lt.u32.totalorder %s3225_s19, %s3741_s4 }
 0x12e   : > { %s3234_s0 = scalar_lea.hbm %s3742_s6, %s3018_s18  ;;  %p2424_p11 = scmp.ne.s32.totalorder %s3225_s19, %s2423_s2 }
 0x12f   : > { %p2429_p6 = scmp.lt.u32.totalorder %s2427_s3, %s2423_s2  ;;  %p2431_p3 = scmp.lt.u32.totalorder %s2423_s2, %s3225_s19 }
 0x130   : > { %p2425_p8 = pnand %p2424_p11, %p3739_p5 }
 0x131   : > { %p2430_p4 = por %p2429_p6, %p2428_p0 }
 0x132   : > { %p2426_p2 = pneg %p2425_p8 }
 0x133   : > { %p2432_p12 = por %p2431_p3, %p2430_p4 }
 0x135   : > { %p2433_p13 = pnand %p2432_p12, %p2426_p2 }
 0x137   : > { %2436 = shalt.err (!%p2433_p13)
}
 0x138   : > { %s2437_s10 = scalar_lea.vmem %s3228_s16, 256  ;;  %s2757_s27 = smov [#allocation11]  }
 0x139   : > { %p2438_p10 = scmp.ne.s32.totalorder %s3228_s16, %s2437_s10  ;;  %s2441_s1 = sshll.u32 %s2757_s27, 4  ;;  %s2442_s1 = int_to_ptr.vmem [resolvable:$false] %s2441_s1 }
 0x13a   : > { %s2443_s25 = scalar_lea.vmem %s2442_s1, 512  ;;  %p2444_p1 = scmp.lt.s32.totalorder %s3228_s16, %s2442_s1 }
 0x13b   : > { %p2439_p7 = pnand %p2438_p10, %p3739_p5  ;;  %p2445_p11 = scmp.lt.s32.totalorder %s2443_s25, %s2437_s10 }
 0x13d   : > { %p2440_p9 = pneg %p2439_p7  ;;  %p2446_p8 = por %p2445_p11, %p2444_p1 }
 0x13f   : > { %p2447_p0 = pnand %p2446_p8, %p2440_p9 }
 0x141   : > { %2450 = shalt.err (!%p2447_p0)
}
 0x142   : > { %s3743_s2 = scalar_lea.sflag [#allocation10], %s2985_s20  ;;  %s585_s12 = scalar_lea.vmem [#allocation14], %s3015_s30 }
 0x143   : > { %2048 = dma.hbm_to_vmem [thread:$0]  (%p3739_p5), %s3225_s19, 256, %s3228_s16, %s3743_s2, %s2755_s28, %s2755_s28, %s2756_s14  }
 0x144   : > { %s592_s3 = sshll.u32 %s585_s12, 4  ;;  %s3744_s10 = sld [smem:[#allocation58_spill]]  ;;  %s593_s3 = int_to_ptr.vmem [resolvable:$true] %s592_s3 }
 0x145   : > { %s2451_s1 = scalar_lea.hbm %s3234_s0, 16  ;;  %s2455_s7 = scalar_lea.hbm %s3742_s6, 32 }
 0x146   : > { %p2452_p2 = scmp.ne.s32.totalorder %s3234_s0, %s2451_s1  ;;  %p2456_p3 = scmp.lt.u32.totalorder %s3234_s0, %s3742_s6 }
 0x147   : > { %p2457_p12 = scmp.lt.u32.totalorder %s2455_s7, %s2451_s1  ;;  %p2459_p10 = scmp.lt.u32.totalorder %s2451_s1, %s3234_s0 }
 0x148   : > { %p2453_p6 = pnand %p2452_p2, %p3739_p5 }
 0x149   : > { %p2458_p13 = por %p2457_p12, %p2456_p3 }
 0x14a   : > { %s3267_s27 = scalar_lea.hbm %s3744_s10, %s3184_s5  ;;  %p2454_p4 = pneg %p2453_p6 }
 0x14b   : > { %p2460_p7 = por %p2459_p10, %p2458_p13 }
 0x14d   : > { %p2461_p9 = pnand %p2460_p7, %p2454_p4 }
 0x14f   : > { %2464 = shalt.err (!%p2461_p9)
}
 0x150   : > { %s2465_s5 = scalar_lea.vmem %s593_s3, 16  ;;  %s2758_s19 = smov [#allocation14]  }
 0x151   : > { %p2466_p1 = scmp.ne.s32.totalorder %s593_s3, %s2465_s5  ;;  %s2469_s16 = sshll.u32 %s2758_s19, 4  ;;  %s2470_s16 = int_to_ptr.vmem [resolvable:$false] %s2469_s16 }
 0x152   : > { %s2471_s4 = scalar_lea.vmem %s2470_s16, 32  ;;  %p2472_p0 = scmp.lt.s32.totalorder %s593_s3, %s2470_s16 }
 0x153   : > { %p2467_p11 = pnand %p2466_p1, %p3739_p5  ;;  %p2473_p2 = scmp.lt.s32.totalorder %s2471_s4, %s2465_s5 }
 0x155   : > { %p2468_p8 = pneg %p2467_p11  ;;  %p2474_p6 = por %p2473_p2, %p2472_p0 }
 0x157   : > { %p2475_p3 = pnand %p2474_p6, %p2468_p8 }
 0x159   : > { %2478 = shalt.err (!%p2475_p3)
}
 0x15a   : > { %s3745_s7 = scalar_lea.sflag [#allocation13], %s2985_s20  ;;  %s620_s9 = scalar_lea.vmem [#allocation17], %s3163_s29 }
 0x15b   : > { %2050 = dma.hbm_to_vmem [thread:$0]  (%p3739_p5), %s3234_s0, 16, %s593_s3, %s3745_s7  }
 0x15c   : > { %s627_s11 = sshll.u32 %s620_s9, 4  ;;  %s1913_s2 = sshll.u32 %s3015_s30, 5  ;;  %s3290_s11 = int_to_ptr.vmem [resolvable:$true] %s627_s11 }
 0x15d   : > { %s2479_s12 = scalar_lea.hbm %s3267_s27, 256  ;;  %s2483_s1 = scalar_lea.hbm %s3744_s10, 512 }
 0x15e   : > { %p2480_p4 = scmp.ne.s32.totalorder %s3267_s27, %s2479_s12  ;;  %p2484_p10 = scmp.lt.u32.totalorder %s3267_s27, %s3744_s10 }
 0x15f   : > { %p2485_p7 = scmp.lt.u32.totalorder %s2483_s1, %s2479_s12  ;;  %p2487_p1 = scmp.lt.u32.totalorder %s2479_s12, %s3267_s27 }
 0x160   : > { %p2481_p12 = pnand %p2480_p4, %p3739_p5 }
 0x161   : > { %p2486_p9 = por %p2485_p7, %p2484_p10 }
 0x162   : > { %p2482_p13 = pneg %p2481_p12 }
 0x163   : > { %p2488_p11 = por %p2487_p1, %p2486_p9 }
 0x165   : > { %p2489_p8 = pnand %p2488_p11, %p2482_p13 }
 0x167   : > { %2492 = shalt.err (!%p2489_p8)
}
 0x168   : > { %s2493_s0 = scalar_lea.vmem %s3290_s11, 256  ;;  %s2759_s29 = smov [#allocation17]  }
 0x169   : > { %p2494_p0 = scmp.ne.s32.totalorder %s3290_s11, %s2493_s0  ;;  %s2497_s3 = sshll.u32 %s2759_s29, 4  ;;  %s2498_s3 = int_to_ptr.vmem [resolvable:$false] %s2497_s3 }
 0x16a   : > { %s2499_s19 = scalar_lea.vmem %s2498_s3, 512  ;;  %p2500_p3 = scmp.lt.s32.totalorder %s3290_s11, %s2498_s3 }
 0x16b   : > { %p2495_p2 = pnand %p2494_p0, %p3739_p5  ;;  %p2501_p4 = scmp.lt.s32.totalorder %s2499_s19, %s2493_s0 }
 0x16d   : > { %p2496_p6 = pneg %p2495_p2  ;;  %p2502_p12 = por %p2501_p4, %p2500_p3 }
 0x16f   : > { %p2503_p10 = pnand %p2502_p12, %p2496_p6 }
 0x171   : > { %2506 = shalt.err (!%p2503_p10)
}
 0x172   : > { %s3746_s16 = scalar_lea.sflag [#allocation16], %s2985_s20  ;;  %s1961_s4 = sshll.u32 %s2737_s21, 9 }
 0x173   : > { %2052 = dma.hbm_to_vmem [thread:$0]  (%p3739_p5), %s3267_s27, 256, %s3290_s11, %s3746_s16, %s2755_s28, %s2755_s28, %s2756_s14  }
 0x174   : > { %s658_s7 = scalar_lea.vmem [#allocation20], %s1913_s2  ;;  %s3747_s26 = sld [smem:[#allocation60_spill]] }
 0x175   : > { %s665_s9 = sshll.u32 %s658_s7, 4  ;;  %s3326_s9 = int_to_ptr.vmem [resolvable:$true] %s665_s9 }
 0x17a   : > { %s3324_s1 = scalar_lea.hbm %s3747_s26, %s1961_s4  ;;  %s2511_s2 = scalar_lea.hbm %s3747_s26, 1024 }
 0x17b   : > { %s2507_s25 = scalar_lea.hbm %s3324_s1, 512  ;;  %p2512_p1 = scmp.lt.u32.totalorder %s3324_s1, %s3747_s26 }
 0x17c   : > { %p2508_p13 = scmp.ne.s32.totalorder %s3324_s1, %s2507_s25  ;;  %p2513_p11 = scmp.lt.u32.totalorder %s2511_s2, %s2507_s25 }
 0x17d   : > { %p2515_p0 = scmp.lt.u32.totalorder %s2507_s25, %s3324_s1 }
 0x17e   : > { %p2509_p7 = pnand %p2508_p13, %p3739_p5  ;;  %p2514_p8 = por %p2513_p11, %p2512_p1 }
 0x180   : > { %p2510_p9 = pneg %p2509_p7  ;;  %p2516_p2 = por %p2515_p0, %p2514_p8 }
 0x182   : > { %p2517_p6 = pnand %p2516_p2, %p2510_p9 }
 0x184   : > { %2520 = shalt.err (!%p2517_p6)
}
 0x185   : > { %s2521_s29 = scalar_lea.vmem %s3326_s9, 512  ;;  %s2760_s3 = smov [#allocation20]  }
 0x186   : > { %p2522_p3 = scmp.ne.s32.totalorder %s3326_s9, %s2521_s29  ;;  %s2525_s19 = sshll.u32 %s2760_s3, 4  ;;  %s2526_s19 = int_to_ptr.vmem [resolvable:$false] %s2525_s19 }
 0x187   : > { %s2527_s16 = scalar_lea.vmem %s2526_s19, 1024  ;;  %p2528_p10 = scmp.lt.s32.totalorder %s3326_s9, %s2526_s19 }
 0x188   : > { %p2523_p4 = pnand %p2522_p3, %p3739_p5  ;;  %p2529_p13 = scmp.lt.s32.totalorder %s2527_s16, %s2521_s29 }
 0x18a   : > { %p2524_p12 = pneg %p2523_p4  ;;  %p2530_p7 = por %p2529_p13, %p2528_p10 }
 0x18c   : > { %p2531_p1 = pnand %p2530_p7, %p2524_p12 }
 0x18e   : > { %2534 = shalt.err (!%p2531_p1)
}
 0x18f   : > { %s3748_s4 = scalar_lea.sflag [#allocation19], %s2985_s20  ;;  %s3749_s24 = sld [smem:[#allocation62_spill]] }
 0x190   : > { %2054 = dma.hbm_to_vmem [thread:$0]  (%p3739_p5), %s3324_s1, 512, %s3326_s9, %s3748_s4, %s2755_s28, %s2755_s28, %s2756_s14  }
 0x191   : > { %s695_s27 = scalar_lea.vmem [#allocation23], %s3015_s30 }
 0x192   : > { %s702_s11 = sshll.u32 %s695_s27, 4  ;;  %s703_s11 = int_to_ptr.vmem [resolvable:$true] %s702_s11 }
 0x195   : > { %s3358_s25 = scalar_lea.hbm %s3749_s24, %s3018_s18  ;;  %s2539_s28 = scalar_lea.hbm %s3749_s24, 32 }
 0x196   : > { %s2535_s2 = scalar_lea.hbm %s3358_s25, 16  ;;  %p2540_p0 = scmp.lt.u32.totalorder %s3358_s25, %s3749_s24 }
 0x197   : > { %p2536_p9 = scmp.ne.s32.totalorder %s3358_s25, %s2535_s2  ;;  %p2541_p2 = scmp.lt.u32.totalorder %s2539_s28, %s2535_s2 }
 0x198   : > { %p2543_p3 = scmp.lt.u32.totalorder %s2535_s2, %s3358_s25 }
 0x199   : > { %p2537_p11 = pnand %p2536_p9, %p3739_p5  ;;  %p2542_p6 = por %p2541_p2, %p2540_p0 }
 0x19b   : > { %p2538_p8 = pneg %p2537_p11  ;;  %p2544_p4 = por %p2543_p3, %p2542_p6 }
 0x19d   : > { %p2545_p12 = pnand %p2544_p4, %p2538_p8 }
 0x19f   : > { %2548 = shalt.err (!%p2545_p12)
}
 0x1a0   : > { %s2549_s1 = scalar_lea.vmem %s703_s11, 16  ;;  %s2761_s29 = smov [#allocation23]  }
 0x1a1   : > { %p2550_p10 = scmp.ne.s32.totalorder %s703_s11, %s2549_s1  ;;  %s2553_s3 = sshll.u32 %s2761_s29, 4  ;;  %s2554_s3 = int_to_ptr.vmem [resolvable:$false] %s2553_s3 }
 0x1a2   : > { %s2555_s19 = scalar_lea.vmem %s2554_s3, 32  ;;  %p2556_p1 = scmp.lt.s32.totalorder %s703_s11, %s2554_s3 }
 0x1a3   : > { %p2551_p13 = pnand %p2550_p10, %p3739_p5  ;;  %p2557_p9 = scmp.lt.s32.totalorder %s2555_s19, %s2549_s1 }
 0x1a5   : > { %p2552_p7 = pneg %p2551_p13  ;;  %p2558_p11 = por %p2557_p9, %p2556_p1 }
 0x1a7   : > { %p2559_p0 = pnand %p2558_p11, %p2552_p7 }
 0x1a9   : > { %2562 = shalt.err (!%p2559_p0)
}
 0x1aa   : > { %s3750_s16 = scalar_lea.sflag [#allocation22], %s2985_s20  ;;  %s3751_s12 = sld [smem:[#allocation63_spill]] }
 0x1ab   : > { %2056 = dma.hbm_to_vmem [thread:$0]  (%p3739_p5), %s3358_s25, 16, %s703_s11, %s3750_s16  }
 0x1ac   : > { %s712_s2 = scalar_lea.vmem [#allocation24], %s3015_s30  ;;  %s710_s0 = scalar_lea.sflag [#allocation25], %s3015_s30 }
 0x1ad   : > { %s719_s5 = sshll.u32 %s712_s2, 4  ;;  %s720_s5 = int_to_ptr.vmem [resolvable:$true] %s719_s5 }
 0x1b0   : > { %s3384_s27 = scalar_lea.hbm %s3751_s12, %s3018_s18  ;;  %s2567_s11 = scalar_lea.hbm %s3751_s12, 32 }
 0x1b1   : > { %s2563_s20 = scalar_lea.hbm %s3384_s27, 16  ;;  %p2568_p3 = scmp.lt.u32.totalorder %s3384_s27, %s3751_s12 }
 0x1b2   : > { %p2564_p8 = scmp.ne.s32.totalorder %s3384_s27, %s2563_s20  ;;  %p2569_p4 = scmp.lt.u32.totalorder %s2567_s11, %s2563_s20 }
 0x1b3   : > { %p2571_p10 = scmp.lt.u32.totalorder %s2563_s20, %s3384_s27 }
 0x1b4   : > { %p2565_p2 = pnand %p2564_p8, %p3739_p5  ;;  %p2570_p12 = por %p2569_p4, %p2568_p3 }
 0x1b6   : > { %p2566_p6 = pneg %p2565_p2  ;;  %p2572_p13 = por %p2571_p10, %p2570_p12 }
 0x1b8   : > { %p2573_p7 = pnand %p2572_p13, %p2566_p6 }
 0x1ba   : > { %2576 = shalt.err (!%p2573_p7)
}
 0x1bb   : > { %s2577_s30 = scalar_lea.vmem %s720_s5, 16  ;;  %s2762_s9 = smov [#allocation24]  }
 0x1bc   : > { %p2578_p1 = scmp.ne.s32.totalorder %s720_s5, %s2577_s30  ;;  %s2581_s1 = sshll.u32 %s2762_s9, 4  ;;  %s2582_s1 = int_to_ptr.vmem [resolvable:$false] %s2581_s1 }
 0x1bd   : > { %s2583_s29 = scalar_lea.vmem %s2582_s1, 32  ;;  %p2584_p0 = scmp.lt.s32.totalorder %s720_s5, %s2582_s1 }
 0x1be   : > { %p2579_p9 = pnand %p2578_p1, %p3739_p5  ;;  %p2585_p8 = scmp.lt.s32.totalorder %s2583_s29, %s2577_s30 }
 0x1c0   : > { %p2580_p11 = pneg %p2579_p9  ;;  %p2586_p2 = por %p2585_p8, %p2584_p0 }
 0x1c2   : > { %p2587_p3 = pnand %p2586_p2, %p2580_p11 }
 0x1c4   : > { %2590 = shalt.err (!%p2587_p3)
}
 0x1c5   : > { %2057 = dma.hbm_to_vmem [thread:$0]  (%p3739_p5), %s3384_s27, 16, %s720_s5, %s710_s0  }
 0x1c6 PF: > { %p1919_p6 = scmp.ge.s32.totalorder %s2745_s23, 1  ;;  %p724_p4 = scmp.lt.s32.totalorder %s2745_s23, 5 }
 0x1c8   : > { %p725_p12 = pnand %p1919_p6, %p724_p4 }
 0x1c9   : > { %s3408_s3 = sand.u32 (!%p725_p12), 1, %s2721_s17   ;;  %p3752_p5 = scmp.ne.s32.totalorder (!%p725_p12), %s3713_s13, 0 }
 0x1ca   : > { %728 = sbr.rel (%p725_p12) target bundleno = 3032 (0xbd8), region = 76  ;;  %s1920_s19 = sshll.u32 (!%p725_p12), %s3408_s3, 3 }
 0x1cb   : > { %s731_s16 = scalar_lea.sflag (!%p725_p12), [#allocation4], %s3408_s3  ;;  %s3414_s8 = scalar_lea.vmem (!%p725_p12), [#allocation3], %s1920_s19 }
 0x1d1   : > { %2664 = dma.done.wait (%p3752_p5), %s731_s16, 128  }
 0x1d2   : > { %2666 = vsyncadd (%p3752_p5), %s731_s16, 4294967168  ;;  %s3753_s4 = sld [smem:[#allocation42_spill]]  ;;  %s742_s2 = scalar_lea.vmem [#allocation6], %s3408_s3 }
 0x1d8   : > { %s3421_s7 = sand.u32 1, %s3753_s4  }
 0x1d9   : > { %s740_s27 = scalar_lea.sflag [#allocation7], %s3421_s7 }
 0x1da   : > { %2668 = dma.done.wait (%p3752_p5), %s740_s27, 16  }
 0x1db   : > { %2670 = vsyncadd (%p3752_p5), %s740_s27, 4294967280  ;;  %s3754_s5 = sld [smem:[#allocation37_spill]]  ;;  %s3755_s0 = sld [smem:[#allocation47_spill]] }
 0x1e1   : > { %s3430_s20 = sand.u32 1, %s3754_s5   ;;  %p3756_p10 = scmp.ne.s32.totalorder %s3755_s0, 0 }
 0x1e2   : > { %s3433_s28 = sshll.u32 %s3430_s20, 4 }
 0x1e3   : > { %s751_s25 = scalar_lea.vmem [#allocation8], %s3433_s28 }
 0x1e4   : > { %2672 = dma.done.wait (%p3756_p10), %s740_s27, 256  }
 0x1e5   : > { %2674 = vsyncadd (%p3756_p10), %s740_s27, 4294967040  ;;  %s757_s11 = scalar_lea.sflag [#allocation10], %s3421_s7  ;;  %s759_s13 = scalar_lea.vmem [#allocation9], %s3430_s20 }
 0x1e6   : > { %2676 = dma.done.wait (%p3756_p10), %s757_s11, 272  }
 0x1e7   : > { %2678 = vsyncadd (%p3756_p10), %s757_s11, 4294967024  ;;  %s768_s14 = scalar_lea.vmem [#allocation11], %s3433_s28  ;;  %s774_s18 = scalar_lea.sflag [#allocation13], %s3421_s7 }
 0x1e8   : > { %s776_s30 = scalar_lea.vmem [#allocation12], %s3430_s20 }
 0x1e9   : > { %2680 = dma.done.wait (%p3756_p10), %s774_s18, 32  }
 0x1ea   : > { %2682 = vsyncadd (%p3756_p10), %s774_s18, 4294967264  ;;  %s784_s9 = scalar_lea.vmem [#allocation14], %s3430_s20  ;;  %s790_s1 = scalar_lea.sflag [#allocation16], %s3421_s7 }
 0x1eb   : > { %2684 = dma.done.wait (%p3756_p10), %s790_s1, 272  }
 0x1ec   : > { %2686 = vsyncadd (%p3756_p10), %s790_s1, 4294967024  ;;  %s801_s16 = scalar_lea.vmem [#allocation17], %s3433_s28  ;;  %s807_s4 = scalar_lea.sflag [#allocation19], %s3421_s7 }
 0x1ed   : > { %2688 = dma.done.wait (%p3756_p10), %s807_s4, 528  }
 0x1ee   : > { %2690 = vsyncadd (%p3756_p10), %s807_s4, 4294966768  ;;  %s1924_s5 = sshll.u32 %s3430_s20, 5  ;;  %s824_s18 = scalar_lea.sflag [#allocation22], %s3421_s7 }
 0x1ef   : > { %s3468_s11 = scalar_lea.vmem [#allocation20], %s1924_s5  ;;  %s826_s1 = scalar_lea.vmem [#allocation21], %s3430_s20 }
 0x1f0   : > { %2692 = dma.done.wait (%p3756_p10), %s824_s18, 32  }
 0x1f1   : > { %2694 = vsyncadd (%p3756_p10), %s824_s18, 4294967264  ;;  %s834_s27 = scalar_lea.vmem [#allocation23], %s3430_s20  ;;  %s840_s4 = scalar_lea.sflag [#allocation25], %s3430_s20 }
 0x1f2   : > { %s842_s29 = scalar_lea.vmem [#allocation24], %s3430_s20 }
 0x1f3   : > { %2696 = dma.done.wait (%p3756_p10), %s840_s4, 16  }
 0x1f4   : > { %2698 = vsyncadd (%p3756_p10), %s840_s4, 4294967280  ;;  %s3485_s7 = scalar_lea.vmem [#allocation26], %s1920_s19  ;;  %s3757_s5 = sld [smem:[#allocation40_spill]] }
 0x1fa   : > { %p1926_p13 = scmp.ne.s32.totalorder %s3757_s5, 0 }
 0x1fb   : > { %v948_v0 = vld [vmem:[%s3414_s8] sm:$0xff] (!%p1926_p13)  ;;  %vm949_vm0 = vcmask (!%p1926_p13), 261120  }
 0x1fc   : > { %947 = sbr.rel (%p1926_p13) target bundleno = 515 (0x203), region = 136  ;;  %950 = vst.msk [vmem:[%s3485_s7] sm:$0xff] (!%p1926_p13), %vm949_vm0, %v948_v0 }
 0x203 PF: > { %v2177_v1 = vld [vmem:[%s751_s25] sm:$0xff]   ;;  %v2763_v2 = vmov 0.0   ;;  %v2178_v3 = vld [vmem:[%s751_s25 + $0x8] sm:$0xff]   ;;  %vm2764_vm1 = vmmov 0   ;;  %vm976_vm2 = vcmask 261120   ;;  %s2765_s19 = smov 112  }
 0x204   : > { %1984 = vmatprep.subr.bf16.mxu0 %v2763_v2  ;;  %1992 = vmatprep.subr.bf16.mxu1 %v2763_v2  ;;  %v3499_v4 = vld [vmem:[%s3485_s7] sm:$0xff]  ;;  %v1927_v6 = vld [vmem:[%s759_s13] ss:$0 sm:$0xff]  ;;  %s2766_s8 = smov 96   ;;  %s2767_s0 = smov 80   ;;  %vm1025_vm3 = vcmask 130048  }
 0x205   : > { %1985 = vmatpush3.bf16.msra.mxu0 %v2177_v1  ;;  %1988 = vmatprep.mubr.msk.bf16.mxu0 %vm2764_vm1, %v2763_v2  ;;  %v952_v5 = vpack.c.bf16 %v3499_v4, %v3499_v4  ;;  %v1932_v19 = vld [vmem:[%s742_s2] ss:$0 sm:$0xff]  ;;  %vm1080_vm4 = vcmask 64512   ;;  %s2768_s2 = smov 64   ;;  %s2769_s25 = smov 48   ;;  %vm1098_vm5 = vcmask 1043456  }
 0x206   : > { %1986 = vmatprep.subr.bf16.mxu0 %v2763_v2  ;;  %1994 = vmatprep.mubr.msk.bf16.mxu1 %vm2764_vm1, %v2763_v2  ;;  %v2179_v55 = vld [vmem:[%s768_s14] sm:$0xff]   ;;  %v2180_v56 = vld [vmem:[%s768_s14 + $0x8] sm:$0xff]   ;;  %s2770_s13 = smov 16   ;;  %vm1259_vm6 = vcmask 261248   ;;  %s3758_s28 = scalar_lea.vmem [#allocation15], %s3430_s20  ;;  %vm1468_vm7 = vcmask 523264  }
 0x207   : > { %s3759_s14 = scalar_lea.vmem [#allocation18], %s3430_s20  ;;  %s3762_s4 = sld [smem:[#allocation64_spill]] }
 0x208   : > { %s2771_s20 = smov [#allocation26]  }
 0x209   : > { %1987 = vmatpush3.bf16.msra.mxu0 %v2178_v3 }
 0x20a   : > { %1998 = vmatprep.subr.bf16.mxu0 %v2763_v2 }
 0x20c   : > { %1989 = vmatmul.mubr.msk.bf16.vlgmr.msra.gmra.mrb[0].mxu0 %vm976_vm2, %v952_v5 }
 0x20d   : > { %2000 = vmatprep.mubr.msk.bf16.mxu0 %vm2764_vm1, %v2763_v2 }
 0x2df   : > { %v1014_v7 = vpop.f32.mrb[0].mxu0 }
 0x2e0   : > { %v1015_v8 = vadd.f32 %v1927_v6, %v1014_v7  ;;  %v1990_v9 = vpop.f32.mrb[1].mxu0  ;;  %v1936_v6 = vld [vmem:[%s776_s30] ss:$0 sm:$0xff]  ;;  %s3760_s30 = sld [smem:[#allocation41_spill]] }
 0x2e1   : > { %v1017_v10 = vpop.f32.mrb[2].mxu0 }
 0x2e2   : > { %v1020_v11 = vpack.c.bf16 %v1015_v8, %v1015_v8  ;;  %v1991_v12 = vpop.f32.mrb[3].mxu0 }
 0x2e4   : > { %1143 = vrot.lane.b32.xlu1 %v1020_v11, %s2765_s19  ;;  %1023 = vrot.lane.b32.xlu0 %v1020_v11, %s2766_s8 }
 0x2e8   : > { %1145 = vrot.lane.b32.xlu0 %v1020_v11, %s2767_s0 }
 0x356   : > { %v1024_v13 = vpop.permute.xlu0 %1023  ;;  %v1144_v17 = vpop.permute.xlu1 %1143 }
 0x357   : > { %v1030_v14 = vsel %vm1025_vm3, %v1024_v13, 0 }
 0x358   : > { %1993 = vmatpush3.bf16.xpose.msra.mxu1 %v1030_v14 }
 0x359   : > { %2004 = vmatprep.subr.bf16.mxu1 %v2763_v2 }
 0x35a   : > { %v1146_v15 = vpop.permute.xlu0 %1145 }
 0x35b   : > { %v1151_v16 = vsel %vm1025_vm3, %v1146_v15, 0 }
 0x35f   : > { %1995 = vmatmul.mubr.msk.bf16.vlgmr.msra.gmra.mrb[0].mxu1 %vm1025_vm3, %v1020_v11 }
 0x360   : > { %2005 = vmatpush3.bf16.xpose.msra.mxu1 %v1151_v16  ;;  %2006 = vmatprep.mubr.msk.bf16.mxu1 %vm2764_vm1, %v2763_v2 }
 0x361   : > { %2016 = vmatprep.subr.bf16.mxu1 %v2763_v2 }
 0x367   : > { %2007 = vmatmul.mubr.msk.bf16.vlgmr.msra.gmra.mrb[4].mxu1 %vm1025_vm3, %v1144_v17 }
 0x368   : > { %2020 = vmatprep.mubr.msk.bf16.mxu1 %vm2764_vm1, %v2763_v2  ;;  %2017 = vmatpush3.bf16.msra.mxu1 %v2179_v55 }
 0x369   : > { %2018 = vmatprep.subr.bf16.mxu1 %v2763_v2 }
 0x36c   : > { %2019 = vmatpush3.bf16.msra.mxu1 %v2180_v56 }
 0x36d   : > { %2032 = vmatprep.subr.bf16.mxu1 %v2763_v2 }
 0x432   : > { %v1066_v18 = vpop.f32.mrb[0].mxu1 }
 0x433   : > { %v1072_v20 = vmul.f32 0.25, %v1066_v18  ;;  %v1996_v21 = vpop.f32.mrb[1].mxu1 }
 0x434   : > { %v1069_v22 = vpop.f32.mrb[2].mxu1  ;;  %v2184_v21 = vld [vmem:[%s3468_s11 + $0x8] sm:$0xff]  }
 0x435   : > { %v1997_v23 = vpop.f32.mrb[3].mxu1  ;;  %v1079_v24 = vadd.f32 %v1932_v19, %v1072_v20  ;;  %v2182_v20 = vld [vmem:[%s801_s16 + $0x8] sm:$0xff]  }
 0x437   : > { %v1081_v25 = vsel %vm1080_vm4, %v1079_v24, -inf }
 0x438   : > { %1082 = vmax.xlane.f32.xlu1 %v1081_v25 }
 0x43a   : > { %v1187_v26 = vpop.f32.mrb[4].mxu1 }
 0x43b   : > { %v1193_v27 = vmul.f32 0.25, %v1187_v26  ;;  %v2008_v28 = vpop.f32.mrb[5].mxu1  ;;  %v1940_v26 = vld [vmem:[%s784_s9] ss:$0 sm:$0xff]  ;;  %s3761_s9 = sld [smem:[#allocation48_spill]] }
 0x43c   : > { %v1190_v29 = vpop.f32.mrb[6].mxu1  ;;  %v1941_v28 = vld [vmem:[%s3758_s28] ss:$0 sm:$0xff] }
 0x43d   : > { %v2009_v30 = vpop.f32.mrb[7].mxu1  ;;  %v1194_v31 = vadd.f32 %v1932_v19, %v1193_v27  ;;  %v2181_v19 = vld [vmem:[%s801_s16] sm:$0xff]   ;;  %s1955_s16 = sshll.u32 %s3760_s30, 7 }
 0x43e   : > { %s3583_s5 = scalar_lea.hbm %s3762_s4, %s1955_s16 }
 0x43f   : > { %v1195_v32 = vsel %vm1080_vm4, %v1194_v31, -inf }
 0x440   : > { %1196 = vmax.xlane.f32.xlu0 %v1195_v32  ;;  %v2185_v32 = vld [vmem:[%s3468_s11 + $0x10] sm:$0xff]  }
 0x441   : > { %p3763_p1 = scmp.ne.s32.totalorder %s3761_s9, 0 }
 0x4c5   : > { %v1083_v33 = vpop.xlane.xlu1 %1082 }
 0x4c6   : > { %v1084_v34 = vsub.f32 %v1079_v24, %v1083_v33  ;;  %v2186_v33 = vld [vmem:[%s3468_s11 + $0x18] sm:$0xff]  }
 0x4c8   : > { %v1085_v35 = vmul.f32 1.442695, %v1084_v34  ;;  %v1942_v34 = vld [vmem:[%s3759_s14] ss:$0 sm:$0xff] }
 0x4ca   : > { %2187 = vpow2.f32 %v1085_v35 }
 0x4cd   : > { %v1197_v36 = vpop.xlane.xlu0 %1196 }
 0x4ce   : > { %v1198_v37 = vsub.f32 %v1194_v31, %v1197_v36 }
 0x4d0   : > { %v1199_v38 = vmul.f32 1.442695, %v1198_v37 }
 0x4d2   : > { %2189 = vpow2.f32 %v1199_v38 }
 0x4d4   : > { %v2188_v39 = vpop.eup %2187 }
 0x4d5   : > { %v1087_v40 = vsel %vm1080_vm4, %v2188_v39, 0.0 }
 0x4d6   : > { %1088 = vadd.xlane.f32.xlu0 %v1087_v40 }
 0x4dc   : > { %v2190_v41 = vpop.eup %2189 }
 0x4dd   : > { %v1201_v42 = vsel %vm1080_vm4, %v2190_v41, 0.0 }
 0x4de   : > { %1202 = vadd.xlane.f32.xlu1 %v1201_v42  ;;  %v1946_v42 = vld [vmem:[%s826_s1] ss:$0 sm:$0xff] }
 0x4ec   : > { %1093 = vrot.lane.b32.xlu0 %v1020_v11, %s2768_s2 }
 0x4ef   : > { %1207 = vrot.lane.b32.xlu1 %v1020_v11, %s2769_s25 }
 0x563   : > { %v1089_v43 = vpop.xlane.xlu0 %1088 }
 0x564   : > { %2191 = vrcp.f32 %v1089_v43 }
 0x567   : > { %v1094_v44 = vpop.permute.xlu0 %1093 }
 0x568   : > { %v1100_v45 = vsel %vm1098_vm5, %v1094_v44, 0 }
 0x569   : > { %1999 = vmatpush3.bf16.msra.mxu0 %v1100_v45 }
 0x56a   : > { %2010 = vmatprep.subr.bf16.mxu0 %v2763_v2 }
 0x56b   : > { %v1203_v46 = vpop.xlane.xlu1 %1202 }
 0x56c   : > { %2193 = vrcp.f32 %v1203_v46 }
 0x56e   : > { %v2192_v47 = vpop.eup %2191 }
 0x56f   : > { %v1091_v48 = vmul.f32 %v2192_v47, %v2188_v39  ;;  %v1208_v49 = vpop.permute.xlu1 %1207 }
 0x570   : > { %v1213_v51 = vsel %vm1098_vm5, %v1208_v49, 0 }
 0x571   : > { %v1092_v50 = vpack.c.bf16 %v1091_v48, %v1091_v48 }
 0x573   : > { %2001 = vmatmul.mubr.msk.bf16.vlgmr.msra.gmra.mrb[4].mxu0 %vm1080_vm4, %v1092_v50 }
 0x574   : > { %2011 = vmatpush3.bf16.msra.mxu0 %v1213_v51  ;;  %2012 = vmatprep.mubr.msk.bf16.mxu0 %vm2764_vm1, %v2763_v2 }
 0x575   : > { %2024 = vmatprep.subr.bf16.mxu0 %v2763_v2 }
 0x576   : > { %v2194_v52 = vpop.eup %2193 }
 0x577   : > { %v1205_v53 = vmul.f32 %v2194_v52, %v2190_v41 }
 0x579   : > { %v1206_v54 = vpack.c.bf16 %v1205_v53, %v1205_v53 }
 0x57b   : > { %2013 = vmatmul.mubr.msk.bf16.vlgmr.msra.gmra.mrb[8].mxu0 %vm1080_vm4, %v1206_v54 }
 0x57c   : > { %2028 = vmatprep.mubr.msk.bf16.mxu0 %vm2764_vm1, %v2763_v2  ;;  %2025 = vmatpush3.bf16.msra.mxu0 %v2181_v19 }
 0x57d   : > { %2026 = vmatprep.subr.bf16.mxu0 %v2763_v2 }
 0x580   : > { %2027 = vmatpush3.bf16.msra.mxu0 %v2182_v20 }
 0x646   : > { %v1136_v57 = vpop.f32.mrb[4].mxu0 }
 0x647   : > { %1142 = vst.msk [vmem:[#allocation2] sm:$0xff] %vm1025_vm3, %v1136_v57  ;;  %v2002_v58 = vpop.f32.mrb[5].mxu0 }
 0x648   : > { %v1139_v59 = vpop.f32.mrb[6].mxu0  ;;  %v1952_v58 = vld [vmem:[%s834_s27] ss:$0 sm:$0xff]  ;;  %s1544_s27 = scalar_lea.sflag [#allocation5], %s3408_s3 }
 0x649   : > { %v2003_v60 = vpop.f32.mrb[7].mxu0 }
 0x64a   : > { %v1953_v60 = vld [vmem:[%s842_s29] ss:$0 sm:$0xff]  ;;  %s2595_s29 = sshll.u32 %s2771_s20, 4  ;;  %s2596_s29 = int_to_ptr.vmem [resolvable:$false] %s2595_s29 }
 0x64b   : > { %s2597_s8 = scalar_lea.vmem %s2596_s29, 256 }
 0x64e   : > { %v1249_v61 = vpop.f32.mrb[8].mxu0 }
 0x64f   : > { %1256 = vrot.lane.b32.xlu1 %v1249_v61, %s2770_s13  ;;  %v2014_v62 = vpop.f32.mrb[9].mxu0 }
 0x650   : > { %v1252_v63 = vpop.f32.mrb[10].mxu0 }
 0x651   : > { %v2015_v0 = vpop.f32.mrb[11].mxu0 }
 0x6c1   : > { %v1257_v1 = vpop.permute.xlu1 %1256 }
 0x6c2   : > { %1260 = vst.msk [vmem:[#allocation2] sm:$0xff] %vm1259_vm6, %v1257_v1 }
 0x6c9   : > { %v1261_v3 = vld [vmem:[#allocation2] sm:$0xff] }
 0x6ca   : > { %v1262_v5 = vpack.c.bf16 %v1261_v3, %v1261_v3 }
 0x6cc   : > { %2021 = vmatmul.mubr.msk.bf16.vlgmr.msra.gmra.mrb[8].mxu1 %vm976_vm2, %v1262_v5 }
 0x6cd   : > { %2040 = vmatprep.mubr.msk.bf16.mxu1 %vm2764_vm1, %v2763_v2 }
 0x79f   : > { %v1323_v7 = vpop.f32.mrb[8].mxu1 }
 0x7a0   : > { %v1324_v8 = vadd.f32 %v1936_v6, %v1323_v7  ;;  %v2022_v9 = vpop.f32.mrb[9].mxu1 }
 0x7a1   : > { %v1326_v10 = vpop.f32.mrb[10].mxu1 }
 0x7a2   : > { %v2023_v11 = vpop.f32.mrb[11].mxu1  ;;  %v1329_v12 = vadd.f32 %v1324_v8, %v3499_v4  ;;  %v2183_v4 = vld [vmem:[%s3468_s11] sm:$0xff]   ;;  %s1557_s11 = sshll.u32 %s3485_s7, 4  ;;  %s3585_s11 = int_to_ptr.vmem [resolvable:$true] %s1557_s11 }
 0x7a3   : > { %2033 = vmatpush3.bf16.msra.mxu1 %v2183_v4  ;;  %s2591_s19 = scalar_lea.vmem %s3585_s11, 128  ;;  %p2598_p0 = scmp.lt.s32.totalorder %s3585_s11, %s2596_s29 }
 0x7a4   : > { %v1332_v13 = vsel %vm976_vm2, %v1329_v12, 0.0  ;;  %2034 = vmatprep.subr.bf16.mxu1 %v2763_v2  ;;  %p2592_p7 = scmp.ne.s32.totalorder %s3585_s11, %s2591_s19  ;;  %p2599_p8 = scmp.lt.s32.totalorder %s2597_s8, %s2591_s19 }
 0x7a5   : > { %1333 = vadd.xlane.f32.xlu0 %v1332_v13 }
 0x7a6   : > { %p2593_p9 = pnand %p2592_p7, %p3763_p1  ;;  %p2600_p2 = por %p2599_p8, %p2598_p0 }
 0x7a7   : > { %2035 = vmatpush3.bf16.msra.mxu1 %v2184_v21 }
 0x7a8   : > { %2036 = vmatprep.subr.bf16.mxu1 %v2763_v2  ;;  %p2594_p11 = pneg %p2593_p9 }
 0x7aa   : > { %p2601_p3 = pnand %p2600_p2, %p2594_p11 }
 0x7ab   : > { %2037 = vmatpush3.bf16.msra.mxu1 %v2185_v32 }
 0x7ac   : > { %2038 = vmatprep.subr.bf16.mxu1 %v2763_v2 }
 0x7af   : > { %2039 = vmatpush3.bf16.msra.mxu1 %v2186_v33 }
 0x832   : > { %v1334_v14 = vpop.xlane.xlu0 %1333 }
 0x833   : > { %v1336_v15 = vmul.f32 0.03125, %v1334_v14 }
 0x835   : > { %v1337_v16 = vsub.f32 %v1329_v12, %v1336_v15 }
 0x837   : > { %v1338_v17 = vmul.f32 %v1337_v16, %v1337_v16 }
 0x839   : > { %v1339_v18 = vsel %vm976_vm2, %v1338_v17, 0.0 }
 0x83a   : > { %1340 = vadd.xlane.f32.xlu1 %v1339_v18 }
 0x8c7   : > { %v1341_v22 = vpop.xlane.xlu1 %1340 }
 0x8c8   : > { %v1342_v23 = vmul.f32 0.03125, %v1341_v22 }
 0x8ca   : > { %v1343_v24 = vadd.f32 1e-05, %v1342_v23 }
 0x8cc   : > { %2195 = vrsqrt.f32 %v1343_v24 }
 0x8d6   : > { %v2196_v25 = vpop.eup %2195 }
 0x8d7   : > { %v1345_v27 = vmul.f32 %v2196_v25, %v1337_v16 }
 0x8d9   : > { %v1352_v29 = vmul.f32 %v1940_v26, %v1345_v27 }
 0x8db   : > { %v1359_v30 = vadd.f32 %v1941_v28, %v1352_v29 }
 0x8dd   : > { %v1360_v31 = vpack.c.bf16 %v1359_v30, %v1359_v30 }
 0x8df   : > { %2029 = vmatmul.mubr.msk.bf16.vlgmr.msra.gmra.mrb[12].mxu0 %vm976_vm2, %v1360_v31 }
 0x9b2   : > { %v1421_v35 = vpop.f32.mrb[12].mxu0 }
 0x9b3   : > { %v1422_v36 = vadd.f32 %v1942_v34, %v1421_v35  ;;  %v2030_v37 = vpop.f32.mrb[13].mxu0 }
 0x9b4   : > { %v1424_v38 = vpop.f32.mrb[14].mxu0 }
 0x9b5   : > { %v1427_v39 = vmax.f32 %v1422_v36, 0.0  ;;  %v2031_v40 = vpop.f32.mrb[15].mxu0 }
 0x9b7   : > { %v1428_v41 = vpack.c.bf16 %v1427_v39, %v1427_v39 }
 0x9b9   : > { %2041 = vmatmul.mubr.msk.bf16.vlgmr.msra.gmra.mrb[12].mxu1 %vm1468_vm7, %v1428_v41 }
 0xa8c   : > { %v1506_v43 = vpop.f32.mrb[12].mxu1 }
 0xa8d   : > { %v1507_v44 = vadd.f32 %v1946_v42, %v1506_v43  ;;  %v2042_v45 = vpop.f32.mrb[13].mxu1 }
 0xa8e   : > { %v1509_v46 = vpop.f32.mrb[14].mxu1 }
 0xa8f   : > { %v2043_v2 = vpop.f32.mrb[15].mxu1  ;;  %v1512_v47 = vadd.f32 %v1507_v44, %v1359_v30 }
 0xa91   : > { %v1515_v48 = vsel %vm976_vm2, %v1512_v47, 0.0 }
 0xa92   : > { %1516 = vadd.xlane.f32.xlu0 %v1515_v48 }
 0xb1f   : > { %v1517_v49 = vpop.xlane.xlu0 %1516 }
 0xb20   : > { %v1518_v50 = vmul.f32 0.03125, %v1517_v49 }
 0xb22   : > { %v1519_v51 = vsub.f32 %v1512_v47, %v1518_v50 }
 0xb24   : > { %v1520_v52 = vmul.f32 %v1519_v51, %v1519_v51 }
 0xb26   : > { %v1521_v53 = vsel %vm976_vm2, %v1520_v52, 0.0 }
 0xb27   : > { %1522 = vadd.xlane.f32.xlu0 %v1521_v53 }
 0xbb4   : > { %v1523_v54 = vpop.xlane.xlu0 %1522 }
 0xbb5   : > { %v1524_v55 = vmul.f32 0.03125, %v1523_v54 }
 0xbb7   : > { %v1525_v56 = vadd.f32 1e-05, %v1524_v55 }
 0xbb9   : > { %2197 = vrsqrt.f32 %v1525_v56 }
 0xbc3   : > { %v2198_v57 = vpop.eup %2197 }
 0xbc4   : > { %v1527_v59 = vmul.f32 %v2198_v57, %v1519_v51 }
 0xbc6   : > { %v1534_v61 = vmul.f32 %v1952_v58, %v1527_v59 }
 0xbc8   : > { %v1541_v62 = vadd.f32 %v1953_v60, %v1534_v61 }
 0xbca   : > { %1542 = vst.msk [vmem:[%s3485_s7] sm:$0xff] %vm976_vm2, %v1541_v62 }
 0xbcb   : > { %2604 = shalt.err (!%p2601_p3)
}
 0xbcc   : > { %s2605_s3 = scalar_lea.hbm %s3583_s5, 128  ;;  %s2609_s2 = scalar_lea.hbm %s3762_s4, 256 }
 0xbcd   : > { %p2606_p6 = scmp.ne.s32.totalorder %s3583_s5, %s2605_s3  ;;  %p2610_p5 = scmp.lt.u32.totalorder %s3583_s5, %s3762_s4 }
 0xbce   : > { %p2611_p10 = scmp.lt.u32.totalorder %s2609_s2, %s2605_s3  ;;  %p2613_p7 = scmp.lt.u32.totalorder %s2605_s3, %s3583_s5 }
 0xbcf   : > { %p2607_p4 = pnand %p2606_p6, %p3763_p1 }
 0xbd0   : > { %p2612_p13 = por %p2611_p10, %p2610_p5 }
 0xbd1   : > { %p2608_p12 = pneg %p2607_p4 }
 0xbd2   : > { %p2614_p9 = por %p2613_p7, %p2612_p13 }
 0xbd4   : > { %p2615_p11 = pnand %p2614_p9, %p2608_p12 }
 0xbd6   : > { %2618 = shalt.err (!%p2615_p11)
}
 0xbd7   : > { %2072 = dma.vmem_to_hbm [thread:$0]  (%p3763_p1), %s3585_s11, 128, %s3583_s5, %s1544_s27  }
 0xbd8 PF: > { %s3764_s28 = sld [smem:[#allocation38_spill]]  ;;  %s3765_s14 = sld [smem:[#allocation49_spill]] }
 0xbd9   : > { %p2078_p0 = scmp.ge.s32.totalorder %s2745_s23, 2 }
 0xbde   : > { %s1569_s30 = sand.u32 1, %s3764_s28   ;;  %p3766_p8 = scmp.ne.s32.totalorder %s3765_s14, 0 }
 0xbdf   : > { %s1570_s16 = scalar_lea.sflag [#allocation5], %s1569_s30 }
 0xbe0   : > { %p2075_p2 = pnand %p2078_p0, %p3766_p8 }
 0xbe2   : > { %2700 = dma.done.wait (!%p2075_p2), %s1570_s16, 128  }
 0xbe3   : > { %2702 = vsyncadd (!%p2075_p2), %s1570_s16, 4294967168  ;;  %s51_s23 = sadd.s32 1, %s2745_s23   ;;  %s3767_s29 = sld [smem:[#allocation37_spill]] }
 0xbe4   : > { %p48_p3 = scmp.ge.s32.totalorder %s51_s23, 6   ;;  %s3768_s9 = sld [smem:[#allocation45_spill]] }
 0xbe5   : > { %s3769_s18 = sld [smem:[#allocation39_spill]]  ;;  %s3770_s11 = sld [smem:[#allocation46_spill]] }
 0xbe6   : > { %s3771_s1 = sld [smem:[#allocation43_spill]]  ;;  %s3772_s5 = sld [smem:[#allocation44_spill]] }
 0xbe7   : > { %s3773_s30 = smov %s2713_s15  ;;  %s3775_s16 = smov %s2721_s17 }
 0xbe8   : > { %s3778_s19 = smov %s2737_s21  ;;  %s3779_s20 = smov %s2741_s22 }
 0xbe9   :  { %50 = sbr.rel (!%p48_p3) target bundleno = 39 (0x27), region = 282 }
 0xbea   : > { %s3774_s15 = smov %s3768_s9 }
 0xbeb   : > { %s3776_s17 = smov %s3769_s18  ;;  %s3777_s18 = smov %s3770_s11 }
 0xbec   : > { %s3780_s21 = smov %s3771_s1  ;;  %s3781_s22 = smov %s3772_s5 }
 0xbf0   :  { %1575 = vsyncpa [#allocation4], 1 }
 0xbf1   :  { %1577 = vsyncpa [#allocation4 + $0x1], 1 }
 0xbf2   :  { %1578 = vsyncpa [#allocation7], 1 }
 0xbf3   :  { %1580 = vsyncpa [#allocation7 + $0x1], 1 }
 0xbf4   :  { %1581 = vsyncpa [#allocation10], 1 }
 0xbf5   :  { %1583 = vsyncpa [#allocation10 + $0x1], 1 }
 0xbf6   :  { %1584 = vsyncpa [#allocation13], 1 }
 0xbf7   :  { %1586 = vsyncpa [#allocation13 + $0x1], 1 }
 0xbf8   :  { %1587 = vsyncpa [#allocation16], 1 }
 0xbf9   :  { %1589 = vsyncpa [#allocation16 + $0x1], 1 }
 0xbfa   :  { %1590 = vsyncpa [#allocation19], 1 }
 0xbfb   :  { %1592 = vsyncpa [#allocation19 + $0x1], 1 }
 0xbfc   :  { %1593 = vsyncpa [#allocation22], 1 }
 0xbfd   :  { %1595 = vsyncpa [#allocation22 + $0x1], 1 }
 0xbfe   :  { %1596 = vsyncpa [#allocation25], 1 }
 0xbff   :  { %1598 = vsyncpa [#allocation25 + $0x1], 1 }
 0xc00   :  { %1599 = vsyncpa [#allocation5], 1 }
 0xc01   :  { %1601 = vsyncpa [#allocation5 + $0x1], 1 }

</bundles_post_ra>
